<compile_context>
chip_gen: v5e
topology: v5e:2x2
jax: 0.10.0
libtpu: 0.0.40
codegen_flags: <defaults>
</compile_context>

<pallas_src>
import functools

import jax
import jax.numpy as jnp
import numpy as np
from jax.experimental import pallas as pl
from jax.experimental.pallas import tpu as pltpu


# ------------------------------ fused kernel ------------------------------- #

def mnist_fused_kernel(xpar_ref, b1_ref, s1_ref, b2_ref, s2_ref,
                       wfc_ref, bfc_ref, o_ref, m1_scr):
    """Whole MNISTNet forward for one image; all intermediates stay on-chip.

    xpar_ref : (2, 15, 30)   zero-padded 30x30 input, rows split by parity
    b1_ref   : (3, 30, 224)  conv1 banded weights per kernel row dy (BN folded)
    s1_ref   : (1, 224)      conv1 bias + BN shift, tiled over lanes (w, c)
    b2_ref   : (3, 216, 224) conv2 banded weights (BN folded)
    s2_ref   : (1, 224)      conv2 bias + BN shift
    wfc_ref  : (7, 208, 10)  FC weights per pooled row (flatten order folded in)
    bfc_ref  : (1, 10)       FC bias
    o_ref    : (1, 10)       output log-probabilities
    m1_scr   : (16, 216)     VMEM scratch: H-padded pool1 output
    """
    f32 = jnp.float32
    xe = xpar_ref[0]          # even padded rows 0,2,...,28   -> (15, 30)
    xo = xpar_ref[1]          # odd  padded rows 1,3,...,29   -> (15, 30)

    # ---- conv1 + BN1 + ReLU, computed as even/odd output rows, + 2x2 pool --
    # even output row h=2j uses padded rows (2j, 2j+1, 2j+2);
    # odd  output row h=2j+1 uses padded rows (2j+1, 2j+2, 2j+3).
    # Output lanes are (w, c) with c fastest: lane = 8*w + c.
    a_even = (jnp.dot(xe[0:14], b1_ref[0], preferred_element_type=f32)
              + jnp.dot(xo[0:14], b1_ref[1], preferred_element_type=f32)
              + jnp.dot(xe[1:15], b1_ref[2], preferred_element_type=f32))
    a_odd = (jnp.dot(xo[0:14], b1_ref[0], preferred_element_type=f32)
             + jnp.dot(xe[1:15], b1_ref[1], preferred_element_type=f32)
             + jnp.dot(xo[1:15], b1_ref[2], preferred_element_type=f32))
    s1 = s1_ref[...]
    h_even = jnp.maximum(a_even + s1, 0.0)            # (14, 224)
    h_odd = jnp.maximum(a_odd + s1, 0.0)              # (14, 224)
    hp = jnp.maximum(h_even, h_odd)                   # pooled over H
    # pool over W: max of lane groups (2w', 2w'+1); valid at lane 16*w' + c.
    m1 = jnp.maximum(hp[:, 0:216], hp[:, 8:224])      # (14, 216)

    # ---- stash pool1 with zero H-padding for conv2 -------------------------
    zrow = jnp.zeros((1, 216), f32)
    m1_scr[0:1, :] = zrow
    m1_scr[15:16, :] = zrow
    m1_scr[1:15, :] = m1

    # ---- conv2 + BN2 + ReLU ------------------------------------------------
    # output row h uses H-padded pooled rows (h, h+1, h+2); output lane
    # 16*w + cout.  The "hole" lanes of m1 hit all-zero rows of b2.
    a2 = (jnp.dot(m1_scr[0:14, :], b2_ref[0], preferred_element_type=f32)
          + jnp.dot(m1_scr[1:15, :], b2_ref[1], preferred_element_type=f32)
          + jnp.dot(m1_scr[2:16, :], b2_ref[2], preferred_element_type=f32))
    h2 = jnp.maximum(a2 + s2_ref[...], 0.0)           # (14, 224)

    # ---- 2x2 maxpool, keeping holes (valid at even rows, lanes 32*w'' + c) -
    m2h = jnp.maximum(h2[0:13, :], h2[1:14, :])       # (13, 224)
    m2 = jnp.maximum(m2h[:, 0:208], m2h[:, 16:224])   # (13, 208)

    # ---- dropout(0.15): identity in eval mode ------------------------------
    # ---- FC (PyTorch flatten order folded into wfc) + log_softmax ----------
    logits = bfc_ref[...]                             # (1, 10)
    for j in range(7):
        logits = logits + jnp.dot(m2[2 * j:2 * j + 1, :], wfc_ref[j],
                                  preferred_element_type=f32)
    mx = jnp.max(logits, axis=-1, keepdims=True)
    sh = logits - mx
    lse = jnp.log(jnp.sum(jnp.exp(sh), axis=-1, keepdims=True))
    o_ref[...] = sh - lse


# ------------------------------ Pallas wrapper ------------------------------ #

def mnist_forward(x_nchw, kp):
    """x_nchw: (N, 1, 28, 28) float32 -> (N, 10) log-probabilities."""
    N = x_nchw.shape[0]
    x = x_nchw.reshape(N, 28, 28).astype(jnp.float32)
    xp = jnp.pad(x, ((0, 0), (1, 1), (1, 1)))                     # (N, 30, 30)
    x_par = jnp.stack([xp[:, 0::2, :], xp[:, 1::2, :]], axis=1)   # (N, 2, 15, 30)

    out = pl.pallas_call(
        mnist_fused_kernel,
        out_shape=jax.ShapeDtypeStruct((N, 1, 10), jnp.float32),
        grid=(N,),
        in_specs=[
            pl.BlockSpec((None, 2, 15, 30), lambda i: (i, 0, 0, 0)),
            pl.BlockSpec((3, 30, 224), lambda i: (0, 0, 0)),
            pl.BlockSpec((1, 224), lambda i: (0, 0)),
            pl.BlockSpec((3, 216, 224), lambda i: (0, 0, 0)),
            pl.BlockSpec((1, 224), lambda i: (0, 0)),
            pl.BlockSpec((7, 208, 10), lambda i: (0, 0, 0)),
            pl.BlockSpec((1, 10), lambda i: (0, 0)),
        ],
        out_specs=pl.BlockSpec((None, 1, 10), lambda i: (i, 0, 0)),
        scratch_shapes=[pltpu.VMEM((16, 216), jnp.float32)],
        compiler_params=pltpu.CompilerParams(
            dimension_semantics=("parallel",)),
    )(x_par, kp["b1"], kp["s1"], kp["b2"], kp["s2"], kp["wfc"], kp["bfc"])
    return out.reshape(N, 10)


# ------------------------- init-time weight folding ------------------------- #

def init_raw_params(key):
    """Synthetic PyTorch-layout parameters (eval-mode running stats)."""
    ks = jax.random.split(key, 14)
    return dict(
        w1=0.1 * jax.random.normal(ks[0], (8, 1, 3, 3), jnp.float32),
        b1=0.05 * jax.random.normal(ks[1], (8,), jnp.float32),
        g1=1.0 + 0.1 * jax.random.normal(ks[2], (8,), jnp.float32),
        be1=0.1 * jax.random.normal(ks[3], (8,), jnp.float32),
        rm1=0.05 * jax.random.normal(ks[4], (8,), jnp.float32),
        rv1=1.0 + 0.1 * jnp.abs(jax.random.normal(ks[5], (8,), jnp.float32)),
        w2=0.1 * jax.random.normal(ks[6], (16, 8, 3, 3), jnp.float32),
        b2=0.05 * jax.random.normal(ks[7], (16,), jnp.float32),
        g2=1.0 + 0.1 * jax.random.normal(ks[8], (16,), jnp.float32),
        be2=0.1 * jax.random.normal(ks[9], (16,), jnp.float32),
        rm2=0.05 * jax.random.normal(ks[10], (16,), jnp.float32),
        rv2=1.0 + 0.1 * jnp.abs(jax.random.normal(ks[11], (16,), jnp.float32)),
        wfc=0.05 * jax.random.normal(ks[12], (10, 16 * 7 * 7), jnp.float32),
        bfc=0.05 * jax.random.normal(ks[13], (10,), jnp.float32),
    )


def _fold_bn(bias, gamma, beta, mean, var, eps=1e-5):
    scale = gamma / np.sqrt(var + eps)
    shift = (bias - mean) * scale + beta
    return scale.astype(np.float32), shift.astype(np.float32)


def build_kernel_params(raw, eps=1e-5):
    """Build banded conv matrices / shift rows / FC slabs (zero runtime cost)."""
    r = {k: np.asarray(v) for k, v in raw.items()}
    scale1, shift1 = _fold_bn(r["b1"], r["g1"], r["be1"], r["rm1"], r["rv1"], eps)
    scale2, shift2 = _fold_bn(r["b2"], r["g2"], r["be2"], r["rm2"], r["rv2"], eps)

    # conv1 banded: (3, 30, 28*8); output lane 8*w + c; row = padded col w+dx.
    b1 = np.zeros((3, 30, 28 * 8), np.float32)
    for dy in range(3):
        for dx in range(3):
            for w in range(28):
                for c in range(8):
                    b1[dy, w + dx, 8 * w + c] = r["w1"][c, 0, dy, dx] * scale1[c]

    # conv2 banded: (3, 216, 14*16); input lane 16*wp + cin (odd-w "hole"
    # lanes stay zero); output lane 16*w + cout.  padding=1 in W is implicit.
    b2 = np.zeros((3, 216, 14 * 16), np.float32)
    for dy in range(3):
        for dx in range(3):
            for w in range(14):
                wp = w + dx - 1
                if 0 <= wp <= 13:
                    for cin in range(8):
                        for cout in range(16):
                            b2[dy, 16 * wp + cin, 16 * w + cout] = (
                                r["w2"][cout, cin, dy, dx] * scale2[cout])

    # FC: per pooled row j, (208, 10); valid input lane 32*w'' + c maps to the
    # PyTorch flatten index c*49 + j*7 + w'' ("hole" lanes stay zero).
    wfc = np.zeros((7, 208, 10), np.float32)
    for j in range(7):
        for w in range(7):
            for c in range(16):
                wfc[j, 32 * w + c, :] = r["wfc"][:, c * 49 + j * 7 + w]

    s1 = np.tile(shift1, 28).reshape(1, 224)   # lane 8*w + c -> shift1[c]
    s2 = np.tile(shift2, 14).reshape(1, 224)   # lane 16*w + c -> shift2[c]

    return dict(
        b1=jnp.asarray(b1), s1=jnp.asarray(s1),
        b2=jnp.asarray(b2), s2=jnp.asarray(s2),
        wfc=jnp.asarray(wfc), bfc=jnp.asarray(r["bfc"].reshape(1, 10)),
    )


# --------------------------- pure-JAX reference ----------------------------- #

def reference_forward(x_nchw, r, eps=1e-5):
    """Eval-mode MNISTNet forward in plain JAX/XLA, PyTorch layouts."""
    def conv(x, w, b):
        y = jax.lax.conv_general_dilated(
            x, w, window_strides=(1, 1), padding=((1, 1), (1, 1)),
            dimension_numbers=("NCHW", "OIHW", "NCHW"))
        return y + b.reshape(1, -1, 1, 1)

    def bn(x, g, be, m, v):
        inv = g.reshape(1, -1, 1, 1) / jnp.sqrt(v.reshape(1, -1, 1, 1) + eps)
        return (x - m.reshape(1, -1, 1, 1)) * inv + be.reshape(1, -1, 1, 1)

    def pool(x):
        return jax.lax.reduce_window(x, -jnp.inf, jax.lax.max,
                                     (1, 1, 2, 2), (1, 1, 2, 2), "VALID")

    h = jax.nn.relu(bn(conv(x_nchw, r["w1"], r["b1"]),
                       r["g1"], r["be1"], r["rm1"], r["rv1"]))
    h = pool(h)
    h = jax.nn.relu(bn(conv(h, r["w2"], r["b2"]),
                       r["g2"], r["be2"], r["rm2"], r["rv2"]))
    h = pool(h)
    flat = h.reshape(h.shape[0], -1)            # PyTorch x.view(-1, 16*7*7)
    logits = flat @ r["wfc"].T + r["bfc"]
    return jax.nn.log_softmax(logits, axis=-1)


if __name__ == "__main__":
    key = jax.random.PRNGKey(0)
    pkey, xkey = jax.random.split(key)
    raw = init_raw_params(pkey)
    kparams = build_kernel_params(raw)
    # MNIST-shaped input (28x28 spatial is required by fc = Linear(16*7*7, 10))
    x = jax.random.normal(xkey, (2, 1, 28, 28), jnp.float32)

    fwd = jax.jit(functools.partial(mnist_forward, kp=kparams))
    out = jax.block_until_ready(fwd(x))

    assert out.shape == (2, 10)
    assert out.dtype == jnp.float32
    # log_softmax rows must exponentiate/sum to 1
    assert bool(jnp.allclose(jnp.sum(jnp.exp(out), axis=1), 1.0, atol=1e-4))
    # match the eval-mode PyTorch semantics (pure-JAX reference)
    ref = jax.block_until_ready(reference_forward(x, raw))
    assert bool(jnp.allclose(out, ref, atol=2e-4, rtol=2e-4))
    print("KERNEL_OK")
</pallas_src>

<mosaic_0001>
module attributes {stable_mosaic.version = 11 : i64} {
  func.func @mnist_fused_kernel(%arg0: i32, %arg1: memref<1x2x15x30xf32, #tpu.memory_space<vmem>>, %arg2: memref<3x30x224xf32, #tpu.memory_space<vmem>>, %arg3: memref<1x224xf32, #tpu.memory_space<vmem>>, %arg4: memref<3x216x224xf32, #tpu.memory_space<vmem>>, %arg5: memref<1x224xf32, #tpu.memory_space<vmem>>, %arg6: memref<7x208x10xf32, #tpu.memory_space<vmem>>, %arg7: memref<1x10xf32, #tpu.memory_space<vmem>>, %arg8: memref<1x1x10xf32, #tpu.memory_space<vmem>>, %arg9: memref<16x216xf32, #tpu.memory_space<vmem>>) attributes {dimension_semantics = [#tpu.dimension_semantics<parallel>], iteration_bounds = array<i64: 2>, scalar_prefetch = 0 : i64, scratch_operands = 1 : i64, tpu.core_type = #tpu.core_type<tc>, window_params = [{transform_indices = @transform_0, window_bounds = array<i64: 1, 2, 15, 30>}, {pipeline_mode = #tpu.pipeline_mode<synchronous>, transform_indices = @transform_1, window_bounds = array<i64: 3, 30, 224>}, {pipeline_mode = #tpu.pipeline_mode<synchronous>, transform_indices = @transform_2, window_bounds = array<i64: 1, 224>}, {pipeline_mode = #tpu.pipeline_mode<synchronous>, transform_indices = @transform_3, window_bounds = array<i64: 3, 216, 224>}, {pipeline_mode = #tpu.pipeline_mode<synchronous>, transform_indices = @transform_4, window_bounds = array<i64: 1, 224>}, {pipeline_mode = #tpu.pipeline_mode<synchronous>, transform_indices = @transform_5, window_bounds = array<i64: 7, 208, 10>}, {pipeline_mode = #tpu.pipeline_mode<synchronous>, transform_indices = @transform_6, window_bounds = array<i64: 1, 10>}, {transform_indices = @transform_7, window_bounds = array<i64: 1, 1, 10>}]} {
    %c0 = arith.constant 0 : index
    %c0_0 = arith.constant 0 : index
    %c0_1 = arith.constant 0 : index
    %c0_2 = arith.constant 0 : index
    %0 = vector.load %arg1[%c0, %c0_0, %c0_1, %c0_2] : memref<1x2x15x30xf32, #tpu.memory_space<vmem>>, vector<1x1x15x30xf32>
    %1 = vector.shape_cast %0 : vector<1x1x15x30xf32> to vector<15x30xf32>
    %c0_3 = arith.constant 0 : index
    %c1 = arith.constant 1 : index
    %c0_4 = arith.constant 0 : index
    %c0_5 = arith.constant 0 : index
    %2 = vector.load %arg1[%c0_3, %c1, %c0_4, %c0_5] : memref<1x2x15x30xf32, #tpu.memory_space<vmem>>, vector<1x1x15x30xf32>
    %3 = vector.shape_cast %2 : vector<1x1x15x30xf32> to vector<15x30xf32>
    %4 = vector.extract_strided_slice %1 {offsets = [0, 0], sizes = [14, 30], strides = [1, 1]} : vector<15x30xf32> to vector<14x30xf32>
    %c0_6 = arith.constant 0 : index
    %c0_7 = arith.constant 0 : index
    %c0_8 = arith.constant 0 : index
    %5 = vector.load %arg2[%c0_6, %c0_7, %c0_8] : memref<3x30x224xf32, #tpu.memory_space<vmem>>, vector<1x30x224xf32>
    %6 = vector.shape_cast %5 : vector<1x30x224xf32> to vector<30x224xf32>
    %cst = arith.constant dense<0.000000e+00> : vector<14x224xf32>
    %7 = tpu.matmul %4, %6, %cst {dimension_numbers = #tpu.dot_dimension_numbers<[1], [0], [0], [1], [0, 0, 1, 1], [], []>} : vector<14x30xf32>, vector<30x224xf32>, vector<14x224xf32> -> vector<14x224xf32>
    %8 = vector.extract_strided_slice %3 {offsets = [0, 0], sizes = [14, 30], strides = [1, 1]} : vector<15x30xf32> to vector<14x30xf32>
    %c1_9 = arith.constant 1 : index
    %c0_10 = arith.constant 0 : index
    %c0_11 = arith.constant 0 : index
    %9 = vector.load %arg2[%c1_9, %c0_10, %c0_11] : memref<3x30x224xf32, #tpu.memory_space<vmem>>, vector<1x30x224xf32>
    %10 = vector.shape_cast %9 : vector<1x30x224xf32> to vector<30x224xf32>
    %cst_12 = arith.constant dense<0.000000e+00> : vector<14x224xf32>
    %11 = tpu.matmul %8, %10, %cst_12 {dimension_numbers = #tpu.dot_dimension_numbers<[1], [0], [0], [1], [0, 0, 1, 1], [], []>} : vector<14x30xf32>, vector<30x224xf32>, vector<14x224xf32> -> vector<14x224xf32>
    %12 = arith.addf %7, %11 : vector<14x224xf32>
    %13 = vector.extract_strided_slice %1 {offsets = [1, 0], sizes = [14, 30], strides = [1, 1]} : vector<15x30xf32> to vector<14x30xf32>
    %c2 = arith.constant 2 : index
    %c0_13 = arith.constant 0 : index
    %c0_14 = arith.constant 0 : index
    %14 = vector.load %arg2[%c2, %c0_13, %c0_14] : memref<3x30x224xf32, #tpu.memory_space<vmem>>, vector<1x30x224xf32>
    %15 = vector.shape_cast %14 : vector<1x30x224xf32> to vector<30x224xf32>
    %cst_15 = arith.constant dense<0.000000e+00> : vector<14x224xf32>
    %16 = tpu.matmul %13, %15, %cst_15 {dimension_numbers = #tpu.dot_dimension_numbers<[1], [0], [0], [1], [0, 0, 1, 1], [], []>} : vector<14x30xf32>, vector<30x224xf32>, vector<14x224xf32> -> vector<14x224xf32>
    %17 = arith.addf %12, %16 : vector<14x224xf32>
    %18 = vector.extract_strided_slice %3 {offsets = [0, 0], sizes = [14, 30], strides = [1, 1]} : vector<15x30xf32> to vector<14x30xf32>
    %c0_16 = arith.constant 0 : index
    %c0_17 = arith.constant 0 : index
    %c0_18 = arith.constant 0 : index
    %19 = vector.load %arg2[%c0_16, %c0_17, %c0_18] : memref<3x30x224xf32, #tpu.memory_space<vmem>>, vector<1x30x224xf32>
    %20 = vector.shape_cast %19 : vector<1x30x224xf32> to vector<30x224xf32>
    %cst_19 = arith.constant dense<0.000000e+00> : vector<14x224xf32>
    %21 = tpu.matmul %18, %20, %cst_19 {dimension_numbers = #tpu.dot_dimension_numbers<[1], [0], [0], [1], [0, 0, 1, 1], [], []>} : vector<14x30xf32>, vector<30x224xf32>, vector<14x224xf32> -> vector<14x224xf32>
    %22 = vector.extract_strided_slice %1 {offsets = [1, 0], sizes = [14, 30], strides = [1, 1]} : vector<15x30xf32> to vector<14x30xf32>
    %c1_20 = arith.constant 1 : index
    %c0_21 = arith.constant 0 : index
    %c0_22 = arith.constant 0 : index
    %23 = vector.load %arg2[%c1_20, %c0_21, %c0_22] : memref<3x30x224xf32, #tpu.memory_space<vmem>>, vector<1x30x224xf32>
    %24 = vector.shape_cast %23 : vector<1x30x224xf32> to vector<30x224xf32>
    %cst_23 = arith.constant dense<0.000000e+00> : vector<14x224xf32>
    %25 = tpu.matmul %22, %24, %cst_23 {dimension_numbers = #tpu.dot_dimension_numbers<[1], [0], [0], [1], [0, 0, 1, 1], [], []>} : vector<14x30xf32>, vector<30x224xf32>, vector<14x224xf32> -> vector<14x224xf32>
    %26 = arith.addf %21, %25 : vector<14x224xf32>
    %27 = vector.extract_strided_slice %3 {offsets = [1, 0], sizes = [14, 30], strides = [1, 1]} : vector<15x30xf32> to vector<14x30xf32>
    %c2_24 = arith.constant 2 : index
    %c0_25 = arith.constant 0 : index
    %c0_26 = arith.constant 0 : index
    %28 = vector.load %arg2[%c2_24, %c0_25, %c0_26] : memref<3x30x224xf32, #tpu.memory_space<vmem>>, vector<1x30x224xf32>
    %29 = vector.shape_cast %28 : vector<1x30x224xf32> to vector<30x224xf32>
    %cst_27 = arith.constant dense<0.000000e+00> : vector<14x224xf32>
    %30 = tpu.matmul %27, %29, %cst_27 {dimension_numbers = #tpu.dot_dimension_numbers<[1], [0], [0], [1], [0, 0, 1, 1], [], []>} : vector<14x30xf32>, vector<30x224xf32>, vector<14x224xf32> -> vector<14x224xf32>
    %31 = arith.addf %26, %30 : vector<14x224xf32>
    %c0_28 = arith.constant 0 : index
    %c0_29 = arith.constant 0 : index
    %32 = vector.load %arg3[%c0_28, %c0_29] : memref<1x224xf32, #tpu.memory_space<vmem>>, vector<1x224xf32>
    %33 = vector.broadcast %32 : vector<1x224xf32> to vector<14x224xf32>
    %34 = arith.addf %17, %33 : vector<14x224xf32>
    %cst_30 = arith.constant 0.000000e+00 : f32
    %35 = vector.broadcast %cst_30 : f32 to vector<14x224xf32>
    %36 = arith.maximumf %34, %35 : vector<14x224xf32>
    %37 = vector.broadcast %32 : vector<1x224xf32> to vector<14x224xf32>
    %38 = arith.addf %31, %37 : vector<14x224xf32>
    %cst_31 = arith.constant 0.000000e+00 : f32
    %39 = vector.broadcast %cst_31 : f32 to vector<14x224xf32>
    %40 = arith.maximumf %38, %39 : vector<14x224xf32>
    %41 = arith.maximumf %36, %40 : vector<14x224xf32>
    %42 = vector.extract_strided_slice %41 {offsets = [0, 0], sizes = [14, 216], strides = [1, 1]} : vector<14x224xf32> to vector<14x216xf32>
    %43 = vector.extract_strided_slice %41 {offsets = [0, 8], sizes = [14, 216], strides = [1, 1]} : vector<14x224xf32> to vector<14x216xf32>
    %44 = arith.maximumf %42, %43 : vector<14x216xf32>
    %cst_32 = arith.constant 0.000000e+00 : f32
    %45 = vector.broadcast %cst_32 : f32 to vector<1x216xf32>
    %c0_33 = arith.constant 0 : index
    %c0_34 = arith.constant 0 : index
    %46 = vector.load %arg9[%c0_33, %c0_34] : memref<16x216xf32, #tpu.memory_space<vmem>>, vector<1x216xf32>
    tpu.vector_store %arg9[%c0_33, %c0_34], %45 {strides = array<i32>} : memref<16x216xf32, #tpu.memory_space<vmem>>, vector<1x216xf32>,
    %c15 = arith.constant 15 : index
    %c0_35 = arith.constant 0 : index
    %47 = vector.load %arg9[%c15, %c0_35] : memref<16x216xf32, #tpu.memory_space<vmem>>, vector<1x216xf32>
    tpu.vector_store %arg9[%c15, %c0_35], %45 {strides = array<i32>} : memref<16x216xf32, #tpu.memory_space<vmem>>, vector<1x216xf32>,
    %c1_36 = arith.constant 1 : index
    %c0_37 = arith.constant 0 : index
    %48 = vector.load %arg9[%c1_36, %c0_37] : memref<16x216xf32, #tpu.memory_space<vmem>>, vector<14x216xf32>
    tpu.vector_store %arg9[%c1_36, %c0_37], %44 {strides = array<i32>} : memref<16x216xf32, #tpu.memory_space<vmem>>, vector<14x216xf32>,
    %c0_38 = arith.constant 0 : index
    %c0_39 = arith.constant 0 : index
    %49 = vector.load %arg9[%c0_38, %c0_39] : memref<16x216xf32, #tpu.memory_space<vmem>>, vector<14x216xf32>
    %c0_40 = arith.constant 0 : index
    %c0_41 = arith.constant 0 : index
    %c0_42 = arith.constant 0 : index
    %50 = vector.load %arg4[%c0_40, %c0_41, %c0_42] : memref<3x216x224xf32, #tpu.memory_space<vmem>>, vector<1x216x224xf32>
    %51 = vector.shape_cast %50 : vector<1x216x224xf32> to vector<216x224xf32>
    %cst_43 = arith.constant dense<0.000000e+00> : vector<14x224xf32>
    %52 = tpu.matmul %49, %51, %cst_43 {dimension_numbers = #tpu.dot_dimension_numbers<[1], [0], [0], [1], [0, 0, 1, 1], [], []>} : vector<14x216xf32>, vector<216x224xf32>, vector<14x224xf32> -> vector<14x224xf32>
    %c1_44 = arith.constant 1 : index
    %c0_45 = arith.constant 0 : index
    %53 = vector.load %arg9[%c1_44, %c0_45] : memref<16x216xf32, #tpu.memory_space<vmem>>, vector<14x216xf32>
    %c1_46 = arith.constant 1 : index
    %c0_47 = arith.constant 0 : index
    %c0_48 = arith.constant 0 : index
    %54 = vector.load %arg4[%c1_46, %c0_47, %c0_48] : memref<3x216x224xf32, #tpu.memory_space<vmem>>, vector<1x216x224xf32>
    %55 = vector.shape_cast %54 : vector<1x216x224xf32> to vector<216x224xf32>
    %cst_49 = arith.constant dense<0.000000e+00> : vector<14x224xf32>
    %56 = tpu.matmul %53, %55, %cst_49 {dimension_numbers = #tpu.dot_dimension_numbers<[1], [0], [0], [1], [0, 0, 1, 1], [], []>} : vector<14x216xf32>, vector<216x224xf32>, vector<14x224xf32> -> vector<14x224xf32>
    %57 = arith.addf %52, %56 : vector<14x224xf32>
    %c2_50 = arith.constant 2 : index
    %c0_51 = arith.constant 0 : index
    %58 = vector.load %arg9[%c2_50, %c0_51] : memref<16x216xf32, #tpu.memory_space<vmem>>, vector<14x216xf32>
    %c2_52 = arith.constant 2 : index
    %c0_53 = arith.constant 0 : index
    %c0_54 = arith.constant 0 : index
    %59 = vector.load %arg4[%c2_52, %c0_53, %c0_54] : memref<3x216x224xf32, #tpu.memory_space<vmem>>, vector<1x216x224xf32>
    %60 = vector.shape_cast %59 : vector<1x216x224xf32> to vector<216x224xf32>
    %cst_55 = arith.constant dense<0.000000e+00> : vector<14x224xf32>
    %61 = tpu.matmul %58, %60, %cst_55 {dimension_numbers = #tpu.dot_dimension_numbers<[1], [0], [0], [1], [0, 0, 1, 1], [], []>} : vector<14x216xf32>, vector<216x224xf32>, vector<14x224xf32> -> vector<14x224xf32>
    %62 = arith.addf %57, %61 : vector<14x224xf32>
    %c0_56 = arith.constant 0 : index
    %c0_57 = arith.constant 0 : index
    %63 = vector.load %arg5[%c0_56, %c0_57] : memref<1x224xf32, #tpu.memory_space<vmem>>, vector<1x224xf32>
    %64 = vector.broadcast %63 : vector<1x224xf32> to vector<14x224xf32>
    %65 = arith.addf %62, %64 : vector<14x224xf32>
    %cst_58 = arith.constant 0.000000e+00 : f32
    %66 = vector.broadcast %cst_58 : f32 to vector<14x224xf32>
    %67 = arith.maximumf %65, %66 : vector<14x224xf32>
    %68 = vector.extract_strided_slice %67 {offsets = [0, 0], sizes = [13, 224], strides = [1, 1]} : vector<14x224xf32> to vector<13x224xf32>
    %69 = vector.extract_strided_slice %67 {offsets = [1, 0], sizes = [13, 224], strides = [1, 1]} : vector<14x224xf32> to vector<13x224xf32>
    %70 = arith.maximumf %68, %69 : vector<13x224xf32>
    %71 = vector.extract_strided_slice %70 {offsets = [0, 0], sizes = [13, 208], strides = [1, 1]} : vector<13x224xf32> to vector<13x208xf32>
    %72 = vector.extract_strided_slice %70 {offsets = [0, 16], sizes = [13, 208], strides = [1, 1]} : vector<13x224xf32> to vector<13x208xf32>
    %73 = arith.maximumf %71, %72 : vector<13x208xf32>
    %c0_59 = arith.constant 0 : index
    %c0_60 = arith.constant 0 : index
    %74 = vector.load %arg7[%c0_59, %c0_60] : memref<1x10xf32, #tpu.memory_space<vmem>>, vector<1x10xf32>
    %75 = vector.extract_strided_slice %73 {offsets = [0, 0], sizes = [1, 208], strides = [1, 1]} : vector<13x208xf32> to vector<1x208xf32>
    %c0_61 = arith.constant 0 : index
    %c0_62 = arith.constant 0 : index
    %c0_63 = arith.constant 0 : index
    %76 = vector.load %arg6[%c0_61, %c0_62, %c0_63] : memref<7x208x10xf32, #tpu.memory_space<vmem>>, vector<1x208x10xf32>
    %77 = vector.shape_cast %76 : vector<1x208x10xf32> to vector<208x10xf32>
    %cst_64 = arith.constant dense<0.000000e+00> : vector<1x10xf32>
    %78 = tpu.matmul %75, %77, %cst_64 {dimension_numbers = #tpu.dot_dimension_numbers<[1], [0], [0], [1], [0, 0, 1, 1], [], []>} : vector<1x208xf32>, vector<208x10xf32>, vector<1x10xf32> -> vector<1x10xf32>
    %79 = arith.addf %74, %78 : vector<1x10xf32>
    %80 = vector.extract_strided_slice %73 {offsets = [2, 0], sizes = [1, 208], strides = [1, 1]} : vector<13x208xf32> to vector<1x208xf32>
    %c1_65 = arith.constant 1 : index
    %c0_66 = arith.constant 0 : index
    %c0_67 = arith.constant 0 : index
    %81 = vector.load %arg6[%c1_65, %c0_66, %c0_67] : memref<7x208x10xf32, #tpu.memory_space<vmem>>, vector<1x208x10xf32>
    %82 = vector.shape_cast %81 : vector<1x208x10xf32> to vector<208x10xf32>
    %cst_68 = arith.constant dense<0.000000e+00> : vector<1x10xf32>
    %83 = tpu.matmul %80, %82, %cst_68 {dimension_numbers = #tpu.dot_dimension_numbers<[1], [0], [0], [1], [0, 0, 1, 1], [], []>} : vector<1x208xf32>, vector<208x10xf32>, vector<1x10xf32> -> vector<1x10xf32>
    %84 = arith.addf %79, %83 : vector<1x10xf32>
    %85 = vector.extract_strided_slice %73 {offsets = [4, 0], sizes = [1, 208], strides = [1, 1]} : vector<13x208xf32> to vector<1x208xf32>
    %c2_69 = arith.constant 2 : index
    %c0_70 = arith.constant 0 : index
    %c0_71 = arith.constant 0 : index
    %86 = vector.load %arg6[%c2_69, %c0_70, %c0_71] : memref<7x208x10xf32, #tpu.memory_space<vmem>>, vector<1x208x10xf32>
    %87 = vector.shape_cast %86 : vector<1x208x10xf32> to vector<208x10xf32>
    %cst_72 = arith.constant dense<0.000000e+00> : vector<1x10xf32>
    %88 = tpu.matmul %85, %87, %cst_72 {dimension_numbers = #tpu.dot_dimension_numbers<[1], [0], [0], [1], [0, 0, 1, 1], [], []>} : vector<1x208xf32>, vector<208x10xf32>, vector<1x10xf32> -> vector<1x10xf32>
    %89 = arith.addf %84, %88 : vector<1x10xf32>
    %90 = vector.extract_strided_slice %73 {offsets = [6, 0], sizes = [1, 208], strides = [1, 1]} : vector<13x208xf32> to vector<1x208xf32>
    %c3 = arith.constant 3 : index
    %c0_73 = arith.constant 0 : index
    %c0_74 = arith.constant 0 : index
    %91 = vector.load %arg6[%c3, %c0_73, %c0_74] : memref<7x208x10xf32, #tpu.memory_space<vmem>>, vector<1x208x10xf32>
    %92 = vector.shape_cast %91 : vector<1x208x10xf32> to vector<208x10xf32>
    %cst_75 = arith.constant dense<0.000000e+00> : vector<1x10xf32>
    %93 = tpu.matmul %90, %92, %cst_75 {dimension_numbers = #tpu.dot_dimension_numbers<[1], [0], [0], [1], [0, 0, 1, 1], [], []>} : vector<1x208xf32>, vector<208x10xf32>, vector<1x10xf32> -> vector<1x10xf32>
    %94 = arith.addf %89, %93 : vector<1x10xf32>
    %95 = vector.extract_strided_slice %73 {offsets = [8, 0], sizes = [1, 208], strides = [1, 1]} : vector<13x208xf32> to vector<1x208xf32>
    %c4 = arith.constant 4 : index
    %c0_76 = arith.constant 0 : index
    %c0_77 = arith.constant 0 : index
    %96 = vector.load %arg6[%c4, %c0_76, %c0_77] : memref<7x208x10xf32, #tpu.memory_space<vmem>>, vector<1x208x10xf32>
    %97 = vector.shape_cast %96 : vector<1x208x10xf32> to vector<208x10xf32>
    %cst_78 = arith.constant dense<0.000000e+00> : vector<1x10xf32>
    %98 = tpu.matmul %95, %97, %cst_78 {dimension_numbers = #tpu.dot_dimension_numbers<[1], [0], [0], [1], [0, 0, 1, 1], [], []>} : vector<1x208xf32>, vector<208x10xf32>, vector<1x10xf32> -> vector<1x10xf32>
    %99 = arith.addf %94, %98 : vector<1x10xf32>
    %100 = vector.extract_strided_slice %73 {offsets = [10, 0], sizes = [1, 208], strides = [1, 1]} : vector<13x208xf32> to vector<1x208xf32>
    %c5 = arith.constant 5 : index
    %c0_79 = arith.constant 0 : index
    %c0_80 = arith.constant 0 : index
    %101 = vector.load %arg6[%c5, %c0_79, %c0_80] : memref<7x208x10xf32, #tpu.memory_space<vmem>>, vector<1x208x10xf32>
    %102 = vector.shape_cast %101 : vector<1x208x10xf32> to vector<208x10xf32>
    %cst_81 = arith.constant dense<0.000000e+00> : vector<1x10xf32>
    %103 = tpu.matmul %100, %102, %cst_81 {dimension_numbers = #tpu.dot_dimension_numbers<[1], [0], [0], [1], [0, 0, 1, 1], [], []>} : vector<1x208xf32>, vector<208x10xf32>, vector<1x10xf32> -> vector<1x10xf32>
    %104 = arith.addf %99, %103 : vector<1x10xf32>
    %105 = vector.extract_strided_slice %73 {offsets = [12, 0], sizes = [1, 208], strides = [1, 1]} : vector<13x208xf32> to vector<1x208xf32>
    %c6 = arith.constant 6 : index
    %c0_82 = arith.constant 0 : index
    %c0_83 = arith.constant 0 : index
    %106 = vector.load %arg6[%c6, %c0_82, %c0_83] : memref<7x208x10xf32, #tpu.memory_space<vmem>>, vector<1x208x10xf32>
    %107 = vector.shape_cast %106 : vector<1x208x10xf32> to vector<208x10xf32>
    %cst_84 = arith.constant dense<0.000000e+00> : vector<1x10xf32>
    %108 = tpu.matmul %105, %107, %cst_84 {dimension_numbers = #tpu.dot_dimension_numbers<[1], [0], [0], [1], [0, 0, 1, 1], [], []>} : vector<1x208xf32>, vector<208x10xf32>, vector<1x10xf32> -> vector<1x10xf32>
    %109 = arith.addf %104, %108 : vector<1x10xf32>
    %cst_85 = arith.constant dense<0xFF800000> : vector<1xf32>
    %110 = vector.multi_reduction <maximumf>, %109, %cst_85 [1] : vector<1x10xf32> to vector<1xf32>
    %111 = vector.shape_cast %110 : vector<1xf32> to vector<1x1xf32>
    %112 = vector.broadcast %111 : vector<1x1xf32> to vector<1x10xf32>
    %113 = arith.subf %109, %112 : vector<1x10xf32>
    %114 = math.exp %113 : vector<1x10xf32>
    %cst_86 = arith.constant dense<0.000000e+00> : vector<1xf32>
    %115 = vector.multi_reduction <add>, %114, %cst_86 [1] : vector<1x10xf32> to vector<1xf32>
    %116 = vector.shape_cast %115 : vector<1xf32> to vector<1x1xf32>
    %117 = math.log %116 : vector<1x1xf32>
    %118 = vector.broadcast %117 : vector<1x1xf32> to vector<1x10xf32>
    %119 = arith.subf %113, %118 : vector<1x10xf32>
    %c0_87 = arith.constant 0 : index
    %c0_88 = arith.constant 0 : index
    %c0_89 = arith.constant 0 : index
    %120 = vector.load %arg8[%c0_87, %c0_88, %c0_89] : memref<1x1x10xf32, #tpu.memory_space<vmem>>, vector<1x1x10xf32>
    %121 = vector.shape_cast %120 : vector<1x1x10xf32> to vector<1x10xf32>
    %122 = vector.shape_cast %119 : vector<1x10xf32> to vector<1x1x10xf32>
    tpu.vector_store %arg8[%c0_87, %c0_88, %c0_89], %122 {strides = array<i32>} : memref<1x1x10xf32, #tpu.memory_space<vmem>>, vector<1x1x10xf32>,
    return
  }
  func.func @transform_0(%arg0: i32) -> (i32, i32, i32, i32) {
    %c0_i32 = arith.constant 0 : i32
    %c0_i32_0 = arith.constant 0 : i32
    %c0_i32_1 = arith.constant 0 : i32
    %c0_i32_2 = arith.constant 0 : i32
    return %arg0, %c0_i32, %c0_i32_0, %c0_i32_1 : i32, i32, i32, i32
  }
  func.func @transform_1(%arg0: i32) -> (i32, i32, i32) {
    %c0_i32 = arith.constant 0 : i32
    %c0_i32_0 = arith.constant 0 : i32
    %c0_i32_1 = arith.constant 0 : i32
    %c0_i32_2 = arith.constant 0 : i32
    return %c0_i32, %c0_i32_0, %c0_i32_1 : i32, i32, i32
  }
  func.func @transform_2(%arg0: i32) -> (i32, i32) {
    %c0_i32 = arith.constant 0 : i32
    %c0_i32_0 = arith.constant 0 : i32
    %c0_i32_1 = arith.constant 0 : i32
    return %c0_i32, %c0_i32_0 : i32, i32
  }
  func.func @transform_3(%arg0: i32) -> (i32, i32, i32) {
    %c0_i32 = arith.constant 0 : i32
    %c0_i32_0 = arith.constant 0 : i32
    %c0_i32_1 = arith.constant 0 : i32
    %c0_i32_2 = arith.constant 0 : i32
    return %c0_i32, %c0_i32_0, %c0_i32_1 : i32, i32, i32
  }
  func.func @transform_4(%arg0: i32) -> (i32, i32) {
    %c0_i32 = arith.constant 0 : i32
    %c0_i32_0 = arith.constant 0 : i32
    %c0_i32_1 = arith.constant 0 : i32
    return %c0_i32, %c0_i32_0 : i32, i32
  }
  func.func @transform_5(%arg0: i32) -> (i32, i32, i32) {
    %c0_i32 = arith.constant 0 : i32
    %c0_i32_0 = arith.constant 0 : i32
    %c0_i32_1 = arith.constant 0 : i32
    %c0_i32_2 = arith.constant 0 : i32
    return %c0_i32, %c0_i32_0, %c0_i32_1 : i32, i32, i32
  }
  func.func @transform_6(%arg0: i32) -> (i32, i32) {
    %c0_i32 = arith.constant 0 : i32
    %c0_i32_0 = arith.constant 0 : i32
    %c0_i32_1 = arith.constant 0 : i32
    return %c0_i32, %c0_i32_0 : i32, i32
  }
  func.func @transform_7(%arg0: i32) -> (i32, i32, i32) {
    %c0_i32 = arith.constant 0 : i32
    %c0_i32_0 = arith.constant 0 : i32
    %c0_i32_1 = arith.constant 0 : i32
    return %arg0, %c0_i32, %c0_i32_0 : i32, i32, i32
  }
}

</mosaic_0001>

<bundles_post_ra>
// kernel: mnist_forward.1
= control target key start
LH: loop header
LB: loop body
LE: loop exit
PB: predicated region body
PF: predicated region fallthrough
CT: control target
= control target key end

     0   :  { %12 = vsyncpa [#allocation4], 0  ;;  %s2637_s0 = inlined_call_operand.vmem [shape: f32[2,2,15,30], index: 0, kind: input, shape index: {}]   ;;  %s2638_s1 = inlined_call_operand.vmem [shape: f32[3,30,224], index: 1, kind: input, shape index: {}]   ;;  %s2639_s2 = inlined_call_operand.vmem [shape: f32[1,224], index: 2, kind: input, shape index: {}]   ;;  %s2640_s3 = inlined_call_operand.hbm [shape: f32[3,216,224], index: 3, kind: input, shape index: {}]   ;;  %s2641_s4 = inlined_call_operand.vmem [shape: f32[1,224], index: 4, kind: input, shape index: {}]   ;;  %s2642_s5 = inlined_call_operand.hbm [shape: f32[7,208,10], index: 5, kind: input, shape index: {}]   ;;  %s2643_s6 = inlined_call_operand.vmem [shape: f32[1,10], index: 6, kind: input, shape index: {}]   ;;  %s2644_s7 = inlined_call_operand.hbm [shape: f32[2,1,10], index: 7, kind: output, shape index: {}]  }
   0x1   :  { %13 = vsyncpa [#allocation7], 0 }
   0x2   :  { %14 = vsyncpa [#allocation5], 0 }
   0x3   :  { %16 = vsyncpa [#allocation5 + $0x1], 0  ;;  %s2261_s24 = smov 0   ;;  %s2263_s25 = smov 0  }
   0x4   :  { %s2265_s26 = smov 0   ;;  %s2267_s27 = smov 0  }
   0x5 LB: > { %s2282_s28 = sadd.s32 4294967295, %s2210_s27   ;;  %s1915_s29 = sadd.s32 4294967294, %s2210_s27   ;;  %s2210_s27 = sphi %s2267_s27, %s2651_s27   ;;  %s2206_s26 = sphi %s2265_s26, %s2650_s26   ;;  %s2202_s25 = sphi %s2263_s25, %s2649_s25   ;;  %s2198_s24 = sphi %s2261_s24, %s2648_s24  }
   0x6   : > { %s2286_s30 = sadd.s32 1, %s2210_s27   ;;  %s181_s8 = sadd.s32 1, %s2206_s26 }
   0x7   : > { %s178_s9 = ssub.s32 %s2210_s27, %s2286_s30  ;;  %p191_p0 = scmp.ne.s32.totalorder %s2206_s26, %s2202_s25 }
   0x8   : > { %p179_p1 = scmp.eq.s32.totalorder %s178_s9, 0  ;;  %p192_p2 = scmp.eq.s32.totalorder %s2282_s28, 1 }
   0x9   : > { %p197_p3 = scmp.ne.s32.totalorder %s2202_s25, %s2198_s24  ;;  %p198_p4 = scmp.eq.s32.totalorder %s1915_s29, 1 }
   0xa   : > { %s2297_s10 = scalar_select %p179_p1, %s2206_s26, %s181_s8  }
   0xb   : > { %p2299_p5 = por %p192_p2, %p191_p0  ;;  %p2303_p6 = por %p198_p4, %p197_p3 }
   0xc   : > { %p1916_p7 = scmp.ge.s32.totalorder %s2210_s27, 1  ;;  %p205_p8 = scmp.lt.s32.totalorder %s2210_s27, 3 }
   0xd   : > { %p2030_p9 = scmp.eq.s32.totalorder %s2282_s28, 0  ;;  %s222_s16 = sshll.u32 %s2640_s3, 4  ;;  %s223_s16 = int_to_ptr.hbm [resolvable:$true] %s222_s16 }
   0xe   : > { %p2310_p10 = pnand %p1916_p7, %p205_p8  ;;  %s2212_s17 = smov [#allocation3]  }
   0xf   : > { %s224_s18 = sshll.u32 %s2212_s17, 4  ;;  %s239_s21 = sshll.u32 %s2642_s5, 4  ;;  %s225_s18 = int_to_ptr.vmem [resolvable:$true] %s224_s18  ;;  %s240_s21 = int_to_ptr.hbm [resolvable:$true] %s239_s21 }
  0x10   : > { %p2019_p11 = pneg %p2310_p10  ;;  %s2213_s22 = smov 256  }
  0x11   : > { %s2214_s23 = smov 16   ;;  %s2215_s29 = smov [#allocation6]  }
  0x12   : > { %p2020_p12 = pnand %p2030_p9, %p2019_p11  ;;  %s241_s8 = sshll.u32 %s2215_s29, 4  ;;  %s242_s8 = int_to_ptr.vmem [resolvable:$true] %s241_s8 }
  0x13   : > { %s2216_s9 = smov 128   ;;  %s2217_s14 = smov 8  }
  0x14   : > { %2022 = dma.hbm_to_vmem [thread:$0]  (!%p2020_p12), %s223_s16, 20736, %s225_s18, [#allocation4], %s2213_s22, %s2213_s22, %s2214_s23  }
  0x15   : > { %2025 = dma.hbm_to_vmem [thread:$0]  (!%p2020_p12), %s240_s21, 23296, %s242_s8, [#allocation7], %s2216_s9, %s2216_s9, %s2217_s14  }
  0x16   : > { %268 = sbr.rel (%p2310_p10) target bundleno = 1096 (0x448), region = 48 }
  0x1b   : > { %2185 = dma.done.wait (%p2030_p9), [#allocation4], 20736  }
  0x1c   : > { %2187 = vsyncadd (%p2030_p9), [#allocation4], 4294946560 }
  0x1d   : > { %2189 = dma.done.wait (%p2030_p9), [#allocation7], 23296  }
  0x1e   : > { %2191 = vsyncadd (%p2030_p9), [#allocation7], 4294944000  ;;  %p305_p13 = scmp.lt.s32.totalorder %s2282_s28, 1  ;;  %vm339_vm0 = vcmask 1045504   ;;  %v1933_v0 = vld [vmem:[%s2638_s1 + $0x70] sm:$0x3f]  ;;  %s1834_s29 = scalar_lea.hbm %s2644_s7, %s2282_s28 }
  0x1f   : > { %v1934_v1 = vld [vmem:[%s2638_s1 + $0x78] sm:$0x3f]  ;;  %v1931_v2 = vld [vmem:[%s2638_s1 + $0x60] sm:$0xff]  ;;  %1935 = vmatpush.msk.msra.mxu0 %vm339_vm0, %v1933_v0  ;;  %v1932_v3 = vld [vmem:[%s2638_s1 + $0x68] sm:$0xff]  ;;  %vm332_vm1 = vcmask 244736   ;;  %vm459_vm2 = vcmask 1046528  }
  0x20   : > { %s306_s15 = scalar_select %p305_p13, %s2282_s28, 1  ;;  %1938 = vmatpush.msk.msra.mxu1 %vm339_vm0, %v1934_v1  ;;  %v2353_v4 = vld [vmem:[%s2638_s1 + $0x38] sm:$0x3f]  ;;  %v1929_v5 = vld [vmem:[%s2638_s1 + $0x50] sm:$0xff]  ;;  %v2369_v8 = vld [vmem:[%s2638_s1 + $0x28] sm:$0xff]  ;;  %vm710_vm4 = vcmask 982016  }
  0x21   : > { %2005 = vmatpush.msk.msra.mxu3 %vm339_vm0, %v2353_v4  ;;  %v1930_v6 = vld [vmem:[%s2638_s1 + $0x58] sm:$0xff]  ;;  %v321_v7 = vld [vmem:[%s2638_s1 + $0x30] sm:$0x3f]  ;;  %359 = vmatpush.msra.mxu0 %v1931_v2  ;;  %v2379_v9 = vld [vmem:[%s2638_s1 + $0x20] sm:$0xff]  ;;  %vm746_vm5 = vcmask 719873   ;;  %vm734_vm6 = vcmask 1040384  }
  0x22   : > { %s2000_s16 = sshll.u32 %s306_s15, 5  ;;  %382 = vmatpush.msra.mxu1 %v1932_v3  ;;  %2001 = vmatpush.msk.msra.mxu2 %vm339_vm0, %v321_v7  ;;  %v1927_v10 = vld [vmem:[%s2638_s1 + $0x40] sm:$0xff]  ;;  %v1928_v11 = vld [vmem:[%s2638_s1 + $0x48] sm:$0xff]  ;;  %v2392_v12 = vld [vmem:[%s2638_s1 + $0x18] sm:$0xff]  ;;  %vm749_vm7 = vcmask 718848   ;;  %vm880_vm8 = vcmask 719872  }
  0x23   : > { %s2374_s23 = scalar_lea.vmem %s2637_s0, %s2000_s16  ;;  %2006 = vmatpush.msra.mxu3 %v2369_v8  ;;  %360 = vmatpush.msra.mxu0 %v1929_v5  ;;  %v317_v14 = vld [vmem:[%s2638_s1 + $0x10] sm:$0xff]  ;;  %v2405_v15 = vld [vmem:[%s2638_s1 + $0x8] sm:$0xff]  ;;  %v315_v17 = vld [vmem:[%s2638_s1] sm:$0xff]  ;;  %s2218_s16 = smov 120   ;;  %vm1328_vm9 = vcmask 654336   ;;  %vm1290_vm10 = vcmask 916480  }
  0x24   : > { %383 = vmatpush.msra.mxu1 %v1930_v6  ;;  %v2395_v13 = vld [vmem:[%s2374_s23 + $0x10] sm:$0xff]  ;;  %2002 = vmatpush.msra.mxu2 %v2379_v9  ;;  %v311_v16 = vld [vmem:[%s2374_s23 + $0x8] sm:$0x7f]  ;;  %v1951_v19 = vld [vmem:[%s2638_s1 + $0xa0] sm:$0xff]  ;;  %s2220_s18 = smov 112   ;;  %vm1811_vm11 = vcmask 73728  }
  0x25   : > { %2007 = vmatpush.msra.mxu3 %v2392_v12  ;;  %361 = vmatpush.msra.mxu0 %v1927_v10  ;;  %v1953_v18 = vld [vmem:[%s2638_s1 + $0xb0] sm:$0x3f]  ;;  %v310_v20 = vld [vmem:[%s2374_s23] sm:$0xff]  ;;  %v2431_v22 = vrot.slane %v311_v16, 1  ;;  %v2435_v23 = vld [vmem:[%s2374_s23 + $0x18] sm:$0x7f] }
  0x26   : > { %384 = vmatpush.msra.mxu1 %v1928_v11  ;;  %1936 = vmatmul.msk.f32.vlgmr.msra.gmra.mxu0 %vm332_vm1, %v2395_v13  ;;  %v1949_v21 = vld [vmem:[%s2638_s1 + $0x90] sm:$0xff]  ;;  %v460_v24 = vrot.slane %v310_v20, 1  ;;  %v1947_v25 = vld [vmem:[%s2638_s1 + $0x80] sm:$0xff]  ;;  %v1954_v27 = vld [vmem:[%s2638_s1 + $0xb8] sm:$0x3f]  ;;  %v615_v30 = vrot.slane %v2395_v13, 1 }
  0x27   : > { %1939 = vmatmul.msk.f32.vlgmr.msra.gmra.mxu1 %vm332_vm1, %v2395_v13  ;;  %2003 = vmatpush.msra.mxu2 %v317_v14  ;;  %v1952_v28 = vld [vmem:[%s2638_s1 + $0xa8] sm:$0xff]  ;;  %v1950_v29 = vld [vmem:[%s2638_s1 + $0x98] sm:$0xff]  ;;  %v616_v31 = vrot.slane %v2435_v23, 1  ;;  %v672_v48 = vld [vmem:[%s2639_s2] sm:$0x3]  ;;  %s303_s20 = sand.u32 1, %s2202_s25  }
  0x28   : > { %2008 = vmatpush.msra.mxu3 %v2405_v15  ;;  %1941 = vmatpush.msk.msrb.mxu1 %vm339_vm0, %v321_v7  ;;  %v462_v26 = vsel %vm459_vm2, %v460_v24, %v2431_v22  ;;  %v1948_v32 = vld [vmem:[%s2638_s1 + $0x88] sm:$0xff]  ;;  %v674_v50 = vperm.slane %v672_v48, 0  ;;  %v844_v57 = vld [vmem:[#allocation3 + $0x2a0] sm:$0xff]  ;;  %v842_v59 = vld [vmem:[#allocation3 + $0x290] sm:$0xff]  ;;  %s304_s8 = scalar_lea.vmem [#allocation8], %s303_s20  ;;  %s1838_s14 = sshll.u32 %s1834_s29, 4  ;;  %s1839_s14 = int_to_ptr.hbm [resolvable:$true] %s1838_s14 }
  0x29   : > { %1946 = vmatmul.msk.f32.vlgmr.msra.gmra.mxu3 %vm332_vm1, %v311_v16  ;;  %2004 = vmatpush.msra.mxu2 %v315_v17  ;;  %v617_v33 = vsel %vm459_vm2, %v615_v30, %v616_v31  ;;  %v845_v58 = vld [vmem:[#allocation3 + $0x2a8] sm:$0xff]  ;;  %v843_v61 = vld [vmem:[#allocation3 + $0x298] sm:$0xff]  ;;  %s1836_s9 = sshll.u32 %s304_s8, 4  ;;  %s1826_s15 = scalar_lea.sflag [#allocation5], %s303_s20  ;;  %s1837_s9 = int_to_ptr.vmem [resolvable:$true] %s1836_s9 }
  0x2a   : > { %1955 = vmatpush.msk.msrb.mxu0 %vm339_vm0, %v1953_v18  ;;  %1943 = vmatmul.msk.f32.vlgmr.msra.gmra.mxu2 %vm332_vm1, %v311_v16 }
  0x2b   : > { %417 = vmatpush.msrb.mxu1 %v2379_v9  ;;  %1961 = vmatpush.msk.msrb.mxu2 %vm339_vm0, %v1933_v0  ;;  %v840_v0 = vld [vmem:[#allocation3 + $0x280] sm:$0xff] }
  0x2c   : > { %486 = vmatpush.msrb.mxu0 %v1951_v19  ;;  %1964 = vmatpush.msk.msrb.mxu3 %vm339_vm0, %v1934_v1  ;;  %v841_v1 = vld [vmem:[#allocation3 + $0x288] sm:$0xff] }
  0x2d   : > { %418 = vmatpush.msrb.mxu1 %v317_v14  ;;  %536 = vmatpush.msrb.mxu2 %v1931_v2  ;;  %v866_v2 = vld [vmem:[#allocation3 + $0x350] sm:$0xff] }
  0x2e   : > { %487 = vmatpush.msrb.mxu0 %v1949_v21  ;;  %559 = vmatpush.msrb.mxu3 %v1932_v3  ;;  %v867_v3 = vld [vmem:[#allocation3 + $0x358] sm:$0xff] }
  0x2f   : > { %1937 = vmatmul.msk.f32.gmra.mxu0 %vm332_vm1, %v2435_v23  ;;  %1940 = vmatmul.msk.f32.gmra.mxu1 %vm332_vm1, %v2435_v23 }
  0x30   : > { %537 = vmatpush.msrb.mxu2 %v1929_v5  ;;  %419 = vmatpush.msrb.mxu1 %v315_v17 }
  0x31   : > { %488 = vmatpush.msrb.mxu0 %v1947_v25  ;;  %560 = vmatpush.msrb.mxu3 %v1930_v6 }
  0x32   : > { %1944 = vmatpush.msk.msra.mxu1 %vm339_vm0, %v2353_v4  ;;  %538 = vmatpush.msrb.mxu2 %v1927_v10 }
  0x33   : > { %1962 = vmatmul.msk.f32.vlgmr.msrb.gmra.mxu2 %vm332_vm1, %v462_v26  ;;  %1967 = vmatpush.msk.msra.mxu0 %vm339_vm0, %v321_v7  ;;  %v838_v7 = vld [vmem:[#allocation3 + $0x270] sm:$0xff] }
  0x34   : > { %440 = vmatpush.msra.mxu1 %v2369_v8  ;;  %1973 = vmatpush.msk.msra.mxu2 %vm339_vm0, %v1953_v18 }
  0x35   : > { %561 = vmatpush.msrb.mxu3 %v1928_v11  ;;  %582 = vmatpush.msra.mxu0 %v2379_v9 }
  0x36   : > { %441 = vmatpush.msra.mxu1 %v2392_v12  ;;  %635 = vmatpush.msra.mxu2 %v1951_v19 }
  0x37   : > { %1942 = vmatmul.msk.f32.vlgmr.msrb.gmra.mxu1 %vm332_vm1, %v310_v20  ;;  %1956 = vmatmul.msk.f32.vlgmr.msrb.gmra.mxu0 %vm332_vm1, %v462_v26 }
  0x38   : > { %442 = vmatpush.msra.mxu1 %v2405_v15  ;;  %636 = vmatpush.msra.mxu2 %v1949_v21 }
  0x39   : > { %1965 = vmatmul.msk.f32.vlgmr.msrb.gmra.mxu3 %vm332_vm1, %v462_v26  ;;  %583 = vmatpush.msra.mxu0 %v317_v14  ;;  %v837_v14 = vld [vmem:[#allocation3 + $0x268] sm:$0xff] }
  0x3a   : > { %1958 = vmatpush.msk.msrb.mxu1 %vm339_vm0, %v1954_v27  ;;  %637 = vmatpush.msra.mxu2 %v1947_v25 }
  0x3b   : > { %1963 = vmatmul.msk.f32.gmra.mxu2 %vm332_vm1, %v2431_v22  ;;  %1976 = vmatpush.msk.msra.mxu3 %vm339_vm0, %v1954_v27 }
  0x3c   : > { %509 = vmatpush.msrb.mxu1 %v1952_v28  ;;  %584 = vmatpush.msra.mxu0 %v315_v17 }
  0x3d   : > { %658 = vmatpush.msra.mxu3 %v1952_v28  ;;  %931 = vmatpush.msrb.mxu2 %v845_v58  ;;  %v829_v58 = vld [vmem:[#allocation3 + $0x228] sm:$0xff] }
  0x3e   : > { %510 = vmatpush.msrb.mxu1 %v1950_v29  ;;  %885 = vmatpush.msrb.mxu0 %v844_v57  ;;  %v828_v57 = vld [vmem:[#allocation3 + $0x220] sm:$0xff] }
  0x3f   : > { %1945 = vmatmul.msk.f32.vlgmr.msra.gmra.mxu1 %vm332_vm1, %v310_v20  ;;  %1957 = vmatmul.msk.f32.gmra.mxu0 %vm332_vm1, %v2431_v22 }
  0x40   : > { %511 = vmatpush.msrb.mxu1 %v1948_v32  ;;  %659 = vmatpush.msra.mxu3 %v1950_v29 }
  0x41   : > { %1966 = vmatmul.msk.f32.gmra.mxu3 %vm332_vm1, %v2431_v22  ;;  %886 = vmatpush.msrb.mxu0 %v842_v59  ;;  %v859_v59 = vld [vmem:[#allocation3 + $0x318] sm:$0xff] }
  0x42   : > { %1970 = vmatpush.msk.msra.mxu1 %vm339_vm0, %v2353_v4  ;;  %660 = vmatpush.msra.mxu3 %v1948_v32 }
  0x43   : > { %1974 = vmatmul.msk.f32.vlgmr.msra.gmra.mxu2 %vm332_vm1, %v617_v33  ;;  %887 = vmatpush.msrb.mxu0 %v840_v0  ;;  %v857_v0 = vld [vmem:[#allocation3 + $0x308] sm:$0xff] }
  0x44   : > { %605 = vmatpush.msra.mxu1 %v2369_v8  ;;  %932 = vmatpush.msrb.mxu2 %v843_v61  ;;  %v839_v8 = vld [vmem:[#allocation3 + $0x278] sm:$0xff]  ;;  %v826_v61 = vld [vmem:[#allocation3 + $0x210] sm:$0xff] }
  0x45   : > { %959 = vmatpush.msrb.mxu3 %v867_v3  ;;  %888 = vmatpush.msrb.mxu0 %v838_v7  ;;  %v854_v3 = vld [vmem:[#allocation3 + $0x2f0] sm:$0xff]  ;;  %v852_v7 = vld [vmem:[#allocation3 + $0x2e0] sm:$0xff] }
  0x46   : > { %606 = vmatpush.msra.mxu1 %v2392_v12  ;;  %933 = vmatpush.msrb.mxu2 %v841_v1  ;;  %v824_v1 = vld [vmem:[#allocation3 + $0x200] sm:$0xff] }
  0x47   : > { %1959 = vmatmul.msk.f32.vlgmr.msrb.gmra.mxu1 %vm332_vm1, %v462_v26  ;;  %1968 = vmatmul.msk.f32.vlgmr.msra.gmra.mxu0 %vm332_vm1, %v2395_v13 }
  0x48   : > { %607 = vmatpush.msra.mxu1 %v2405_v15  ;;  %934 = vmatpush.msrb.mxu2 %v839_v8  ;;  %v853_v8 = vld [vmem:[#allocation3 + $0x2e8] sm:$0xff] }
  0x49   : > { %1977 = vmatmul.msk.f32.vlgmr.msra.gmra.mxu3 %vm332_vm1, %v617_v33 }
  0x4a   : > { %913 = vmatpush.msrb.mxu1 %v866_v2  ;;  %935 = vmatpush.msrb.mxu2 %v837_v14  ;;  %v825_v2 = vld [vmem:[#allocation3 + $0x208] sm:$0xff]  ;;  %v818_v14 = vld [vmem:[#allocation3 + $0x1d0] sm:$0xff] }
  0x4b   : > { %1975 = vmatmul.msk.f32.gmra.mxu2 %vm332_vm1, %v616_v31 }
  0x4f   : > { %1960 = vmatmul.msk.f32.gmra.mxu1 %vm332_vm1, %v2431_v22  ;;  %1969 = vmatmul.msk.f32.gmra.mxu0 %vm332_vm1, %v2435_v23 }
  0x51   : > { %1978 = vmatmul.msk.f32.gmra.mxu3 %vm332_vm1, %v616_v31 }
  0x57   : > { %1971 = vmatmul.msk.f32.vlgmr.msra.gmra.mxu1 %vm332_vm1, %v2395_v13  ;;  %v836_v13 = vld [vmem:[#allocation3 + $0x260] sm:$0xff] }
  0x58   : > { %889 = vmatpush.msrb.mxu0 %v836_v13  ;;  %v850_v13 = vld [vmem:[#allocation3 + $0x2d0] sm:$0xff] }
  0x5f   : > { %1972 = vmatmul.msk.f32.gmra.mxu1 %vm332_vm1, %v2435_v23  ;;  %v675_v23 = vperm.slane %v672_v48, 1  ;;  %v865_v48 = vld [vmem:[#allocation3 + $0x348] sm:$0xff] }
  0x60   : > { %960 = vmatpush.msrb.mxu3 %v865_v48  ;;  %v800_v48 = vld [vmem:[#allocation3 + $0x168] sm:$0xff] }
  0xa3   : > { %v363_v34 = vpop.f32.mrf.mxu0 }
  0xa4   : > { %v386_v35 = vpop.f32.mrf.mxu1 }
  0xac   : > { %v366_v36 = vpop.f32.mrf.mxu0  ;;  %v2503_v37 = vpop.f32.mrf.mxu1 }
  0xad   : > { %v424_v38 = vpop.f32.mrf.mxu2  ;;  %v2505_v41 = vpop.f32.mrf.mxu3 }
  0xae   : > { %v425_v62 = vadd.f32 %v424_v38, %v366_v36  ;;  %v448_v30 = vadd.f32 %v2505_v41, %v2503_v37  ;;  %v834_v37 = vld [vmem:[#allocation3 + $0x250] sm:$0xff]  ;;  %v835_v41 = vld [vmem:[#allocation3 + $0x258] sm:$0xff] }
  0xaf   : > { %890 = vmatpush.msrb.mxu0 %v834_v37  ;;  %936 = vmatpush.msrb.mxu2 %v835_v41  ;;  %v777_v37 = vld [vmem:[#allocation3 + $0xb0] sm:$0xff]  ;;  %v799_v41 = vld [vmem:[#allocation3 + $0x160] sm:$0xff] }
  0xb4   : > { %v421_v39 = vpop.f32.mrf.mxu1  ;;  %v490_v40 = vpop.f32.mrf.mxu0 }
  0xb5   : > { %v422_v47 = vadd.f32 %v421_v39, %v363_v34 }
  0xb6   : > { %v540_v42 = vpop.f32.mrf.mxu2 }
  0xb7   : > { %v519_v49 = vadd.f32 %v490_v40, %v422_v47  ;;  %v864_v47 = vld [vmem:[#allocation3 + $0x340] sm:$0xff] }
  0xb8   : > { %914 = vmatpush.msrb.mxu1 %v864_v47  ;;  %v778_v47 = vld [vmem:[#allocation3 + $0xb8] sm:$0xff] }
  0xb9   : > { %v678_v55 = vadd.f32 %v674_v50, %v519_v49  ;;  %v832_v49 = vld [vmem:[#allocation3 + $0x240] sm:$0xff] }
  0xba   : > { %891 = vmatpush.msrb.mxu0 %v832_v49  ;;  %v775_v49 = vld [vmem:[#allocation3 + $0xa0] sm:$0xff] }
  0xbb   : > { %v682_v4 = vmax.f32 %v678_v55, 0.0  ;;  %v860_v55 = vld [vmem:[#allocation3 + $0x320] sm:$0xff] }
  0xbc   : > { %v444_v43 = vpop.f32.mrf.mxu1  ;;  %v493_v44 = vpop.f32.mrf.mxu0 }
  0xbd   : > { %v563_v46 = vpop.f32.mrf.mxu3  ;;  %v521_v5 = vadd.f32 %v493_v44, %v425_v62  ;;  %v445_v18 = vadd.f32 %v444_v43, %v386_v35  ;;  %v827_v62 = vld [vmem:[#allocation3 + $0x218] sm:$0xff] }
  0xbe   : > { %v543_v45 = vpop.f32.mrf.mxu2 }
  0xbf   : > { %v680_v16 = vadd.f32 %v674_v50, %v521_v5  ;;  %v822_v5 = vld [vmem:[#allocation3 + $0x1f0] sm:$0xff] }
  0xc1   : > { %v684_v21 = vmax.f32 %v680_v16, 0.0  ;;  %v848_v16 = vld [vmem:[#allocation3 + $0x2c0] sm:$0xff] }
  0xc4   : > { %v513_v51 = vpop.f32.mrf.mxu1  ;;  %v586_v52 = vpop.f32.mrf.mxu0 }
  0xc5   : > { %v587_v53 = vadd.f32 %v586_v52, %v540_v42  ;;  %v566_v60 = vpop.f32.mrf.mxu3  ;;  %v520_v22 = vadd.f32 %v513_v51, %v445_v18  ;;  %v862_v51 = vld [vmem:[#allocation3 + $0x330] sm:$0xff]  ;;  %v863_v52 = vld [vmem:[#allocation3 + $0x338] sm:$0xff]  ;;  %v816_v18 = vld [vmem:[#allocation3 + $0x1c0] sm:$0xff] }
  0xc6   : > { %v639_v54 = vpop.f32.mrf.mxu2  ;;  %915 = vmatpush.msrb.mxu1 %v862_v51  ;;  %961 = vmatpush.msrb.mxu3 %v863_v52  ;;  %v776_v51 = vld [vmem:[#allocation3 + $0xa8] sm:$0xff]  ;;  %v798_v52 = vld [vmem:[#allocation3 + $0x158] sm:$0xff] }
  0xc7   : > { %v668_v56 = vadd.f32 %v639_v54, %v587_v53  ;;  %v679_v28 = vadd.f32 %v675_v23, %v520_v22  ;;  %v830_v53 = vld [vmem:[#allocation3 + $0x230] sm:$0xff]  ;;  %v831_v54 = vld [vmem:[#allocation3 + $0x238] sm:$0xff]  ;;  %v721_v22 = vlaneseq }
  0xc8   : > { %892 = vmatpush.msrb.mxu0 %v830_v53  ;;  %916 = vmatpush.msrb.mxu1 %v860_v55  ;;  %v773_v53 = vld [vmem:[#allocation3 + $0x90] sm:$0xff]  ;;  %v774_v55 = vld [vmem:[#allocation3 + $0x98] sm:$0xff] }
  0xc9   : > { %v686_v63 = vadd.f32 %v674_v50, %v668_v56  ;;  %v683_v32 = vmax.f32 %v679_v28, 0.0  ;;  %v861_v56 = vld [vmem:[#allocation3 + $0x328] sm:$0xff]  ;;  %v786_v28 = vld [vmem:[#allocation3 + $0xf8] sm:$0xff]  ;;  %vm723_vm3 = vcmp.lt.s32.totalorder %v721_v22, 216 }
  0xca   : > { %962 = vmatpush.msrb.mxu3 %v861_v56  ;;  %893 = vmatpush.msrb.mxu0 %v828_v57  ;;  %v796_v56 = vld [vmem:[#allocation3 + $0x148] sm:$0xff]  ;;  %v771_v57 = vld [vmem:[#allocation3 + $0x80] sm:$0xff] }
  0xcb   : > { %v690_v6 = vmax.f32 %v686_v63, 0.0  ;;  %v856_v63 = vld [vmem:[#allocation3 + $0x300] sm:$0xff] }
  0xcc   : > { %v516_v9 = vpop.f32.mrf.mxu1  ;;  %v589_v10 = vpop.f32.mrf.mxu0  ;;  %963 = vmatpush.msrb.mxu3 %v859_v59  ;;  %894 = vmatpush.msrb.mxu0 %v826_v61  ;;  %v772_v59 = vld [vmem:[#allocation3 + $0x88] sm:$0xff]  ;;  %v769_v61 = vld [vmem:[#allocation3 + $0x70] sm:$0xff] }
  0xcd   : > { %v590_v11 = vadd.f32 %v589_v10, %v543_v45  ;;  %v2510_v12 = vmax.f32 %v682_v4, %v690_v6  ;;  %v662_v20 = vpop.f32.mrf.mxu3  ;;  %v522_v33 = vadd.f32 %v516_v9, %v448_v30  ;;  %v855_v4 = vld [vmem:[#allocation3 + $0x2f8] sm:$0xff]  ;;  %v820_v9 = vld [vmem:[#allocation3 + $0x1e0] sm:$0xff]  ;;  %v821_v10 = vld [vmem:[#allocation3 + $0x1e8] sm:$0xff] }
  0xce   : > { %v642_v15 = vpop.f32.mrf.mxu2  ;;  %964 = vmatpush.msrb.mxu3 %v857_v0  ;;  %895 = vmatpush.msrb.mxu0 %v824_v1  ;;  %v823_v6 = vld [vmem:[#allocation3 + $0x1f8] sm:$0xff]  ;;  %v783_v30 = vld [vmem:[#allocation3 + $0xe0] sm:$0xff]  ;;  %v792_v0 = vld [vmem:[#allocation3 + $0x128] sm:$0xff] }
  0xcf   : > { %v670_v17 = vadd.f32 %v642_v15, %v590_v11  ;;  %702 = vrot.lane.b32.xlu0 %v2510_v12, %s2218_s16  ;;  %v681_v40 = vadd.f32 %v675_v23, %v522_v33  ;;  %v851_v11 = vld [vmem:[#allocation3 + $0x2d8] sm:$0xff]  ;;  %v767_v1 = vld [vmem:[#allocation3 + $0x60] sm:$0xff] }
  0xd0   : > { %965 = vmatpush.msrb.mxu3 %v855_v4  ;;  %896 = vmatpush.msrb.mxu0 %v822_v5  ;;  %v819_v15 = vld [vmem:[#allocation3 + $0x1d8] sm:$0xff] }
  0xd1   : > { %v688_v19 = vadd.f32 %v674_v50, %v670_v17  ;;  %v685_v44 = vmax.f32 %v681_v40, 0.0  ;;  %v833_v50 = vld [vmem:[#allocation3 + $0x248] sm:$0xff]  ;;  %v806_v33 = vld [vmem:[#allocation3 + $0x198] sm:$0xff] }
  0xd2   : > { %937 = vmatpush.msrb.mxu2 %v833_v50  ;;  %966 = vmatpush.msrb.mxu3 %v853_v8  ;;  %v849_v17 = vld [vmem:[#allocation3 + $0x2c8] sm:$0xff]  ;;  %v797_v50 = vld [vmem:[#allocation3 + $0x150] sm:$0xff]  ;;  %v790_v4 = vld [vmem:[#allocation3 + $0x118] sm:$0xff] }
  0xd3   : > { %v692_v24 = vmax.f32 %v688_v19, 0.0  ;;  %897 = vmatpush.msrb.mxu0 %v820_v9  ;;  %v817_v19 = vld [vmem:[#allocation3 + $0x1c8] sm:$0xff]  ;;  %v766_v8 = vld [vmem:[#allocation3 + $0x58] sm:$0xff] }
  0xd4   : > { %v609_v25 = vpop.f32.mrf.mxu1  ;;  %938 = vmatpush.msrb.mxu2 %v831_v54  ;;  %967 = vmatpush.msrb.mxu3 %v851_v11  ;;  %v804_v40 = vld [vmem:[#allocation3 + $0x188] sm:$0xff]  ;;  %v795_v54 = vld [vmem:[#allocation3 + $0x140] sm:$0xff] }
  0xd5   : > { %v610_v26 = vadd.f32 %v609_v25, %v563_v46  ;;  %v2514_v27 = vmax.f32 %v684_v21, %v692_v24  ;;  %v665_v36 = vpop.f32.mrf.mxu3  ;;  %898 = vmatpush.msrb.mxu0 %v818_v14  ;;  %v847_v21 = vld [vmem:[#allocation3 + $0x2b8] sm:$0xff]  ;;  %v785_v25 = vld [vmem:[#allocation3 + $0xf0] sm:$0xff]  ;;  %v788_v9 = vld [vmem:[#allocation3 + $0x108] sm:$0xff] }
  0xd6   : > { %939 = vmatpush.msrb.mxu2 %v829_v58  ;;  %968 = vmatpush.msrb.mxu3 %v849_v17  ;;  %v815_v24 = vld [vmem:[#allocation3 + $0x1b8] sm:$0xff]  ;;  %v793_v58 = vld [vmem:[#allocation3 + $0x130] sm:$0xff]  ;;  %v764_v11 = vld [vmem:[#allocation3 + $0x48] sm:$0xff] }
  0xd7   : > { %v669_v29 = vadd.f32 %v662_v20, %v610_v26  ;;  %706 = vrot.lane.b32.xlu1 %v2514_v27, %s2218_s16  ;;  %899 = vmatpush.msrb.mxu0 %v816_v18  ;;  %v846_v20 = vld [vmem:[#allocation3 + $0x2b0] sm:$0xff]  ;;  %v807_v26 = vld [vmem:[#allocation3 + $0x1a0] sm:$0xff]  ;;  %v762_v14 = vld [vmem:[#allocation3 + $0x38] sm:$0xff] }
  0xd8   : > { %940 = vmatpush.msrb.mxu2 %v827_v62  ;;  %969 = vmatpush.msrb.mxu3 %v847_v21  ;;  %v791_v62 = vld [vmem:[#allocation3 + $0x120] sm:$0xff]  ;;  %v757_v21 = vld [vmem:[#allocation3 + $0x10] sm:$0xff] }
  0xd9   : > { %v687_v31 = vadd.f32 %v675_v23, %v669_v29  ;;  %v808_v29 = vld [vmem:[#allocation3 + $0x1a8] sm:$0xff] }
  0xda   : > { %941 = vmatpush.msrb.mxu2 %v825_v2  ;;  %1011 = vmatpush.msra.mxu3 %v807_v26  ;;  %v789_v2 = vld [vmem:[#allocation3 + $0x110] sm:$0xff]  ;;  %v755_v26 = vld [vmem:[#allocation3] sm:$0xff] }
  0xdb   : > { %v691_v34 = vmax.f32 %v687_v31, 0.0  ;;  %v805_v31 = vld [vmem:[#allocation3 + $0x190] sm:$0xff] }
  0xdc   : > { %v612_v35 = vpop.f32.mrf.mxu1  ;;  %942 = vmatpush.msrb.mxu2 %v823_v6  ;;  %1012 = vmatpush.msra.mxu3 %v805_v31  ;;  %v765_v6 = vld [vmem:[#allocation3 + $0x50] sm:$0xff] }
  0xdd   : > { %v613_v38 = vadd.f32 %v612_v35, %v566_v60  ;;  %v2520_v39 = vmax.f32 %v683_v32, %v691_v34  ;;  %v858_v60 = vld [vmem:[#allocation3 + $0x310] sm:$0xff]  ;;  %v784_v32 = vld [vmem:[#allocation3 + $0xe8] sm:$0xff]  ;;  %v2219_v34 = vmov 0.0  }
  0xde   : > { %917 = vmatpush.msrb.mxu1 %v858_v60  ;;  %943 = vmatpush.msrb.mxu2 %v821_v10  ;;  %725 = vst.msk [vmem:[#allocation2] ss:$8 sm:$0x3] %vm723_vm3, %v2219_v34  ;;  %v781_v35 = vld [vmem:[#allocation3 + $0xd0] sm:$0xff]  ;;  %v794_v60 = vld [vmem:[#allocation3 + $0x138] sm:$0xff]  ;;  %v763_v10 = vld [vmem:[#allocation3 + $0x40] sm:$0xff] }
  0xdf   : > { %v671_v42 = vadd.f32 %v665_v36, %v613_v38  ;;  %704 = vrot.lane.b32.xlu0 %v2520_v39, %s2218_s16  ;;  %v803_v36 = vld [vmem:[#allocation3 + $0x180] sm:$0xff]  ;;  %728 = vst.msk [vmem:[#allocation2 + $0x17] ss:$8 sm:$0x3] %vm723_vm3, %v2219_v34  ;;  %v782_v38 = vld [vmem:[#allocation3 + $0xd8] sm:$0xff] }
  0xe0   : > { %918 = vmatpush.msrb.mxu1 %v856_v63  ;;  %944 = vmatpush.msrb.mxu2 %v819_v15  ;;  %v770_v63 = vld [vmem:[#allocation3 + $0x78] sm:$0xff]  ;;  %v759_v15 = vld [vmem:[#allocation3 + $0x20] sm:$0xff] }
  0xe1   : > { %v689_v43 = vadd.f32 %v675_v23, %v671_v42  ;;  %v814_v23 = vld [vmem:[#allocation3 + $0x1b0] sm:$0xff]  ;;  %1013 = vmatpush.msra.mxu3 %v803_v36  ;;  %v779_v42 = vld [vmem:[#allocation3 + $0xc0] sm:$0xff] }
  0xe2   : > { %919 = vmatpush.msrb.mxu1 %v854_v3  ;;  %945 = vmatpush.msrb.mxu2 %v817_v19  ;;  %v768_v3 = vld [vmem:[#allocation3 + $0x68] sm:$0xff] }
  0xe3   : > { %v693_v45 = vmax.f32 %v689_v43, 0.0  ;;  %900 = vmatpush.msrb.mxu0 %v814_v23  ;;  %v801_v43 = vld [vmem:[#allocation3 + $0x170] sm:$0xff]  ;;  %v758_v23 = vld [vmem:[#allocation3 + $0x18] sm:$0xff] }
  0xe4   : > { %920 = vmatpush.msrb.mxu1 %v852_v7  ;;  %946 = vmatpush.msrb.mxu2 %v815_v24  ;;  %v787_v7 = vld [vmem:[#allocation3 + $0x100] sm:$0xff] }
  0xe5   : > { %v2524_v46 = vmax.f32 %v685_v44, %v693_v45  ;;  %1029 = vmatpush.msra.mxu0 %v786_v28  ;;  %v780_v44 = vld [vmem:[#allocation3 + $0xc8] sm:$0xff]  ;;  %v802_v45 = vld [vmem:[#allocation3 + $0x178] sm:$0xff]  ;;  %1014 = vmatpush.msra.mxu3 %v801_v43 }
  0xe6   : > { %921 = vmatpush.msrb.mxu1 %v850_v13  ;;  %1057 = vmatpush.msra.mxu2 %v808_v29  ;;  %v761_v13 = vld [vmem:[#allocation3 + $0x30] sm:$0xff]  ;;  %v756_v28 = vld [vmem:[#allocation3 + $0x8] sm:$0xff] }
  0xe7   : > { %708 = vrot.lane.b32.xlu1 %v2524_v46, %s2218_s16  ;;  %1030 = vmatpush.msra.mxu0 %v784_v32  ;;  %s2154_s16 = sshra.s32 %s1839_s14, 4  ;;  %s2155_s16 = int_to_ptr.hbm [resolvable:$true] %s2154_s16 }
  0xe8   : > { %922 = vmatpush.msrb.mxu1 %v848_v16  ;;  %1058 = vmatpush.msra.mxu2 %v806_v33  ;;  %v760_v16 = vld [vmem:[#allocation3 + $0x28] sm:$0xff]  ;;  %s2156_s13 = scalar_lea.hbm %s2155_s16, 1  ;;  %p2161_p3 = scmp.lt.s32.totalorder %s2155_s16, %s2644_s7 }
  0xe9   : > { %1031 = vmatpush.msra.mxu0 %v782_v38  ;;  %1015 = vmatpush.msra.mxu3 %v799_v41  ;;  %p2157_p0 = scmp.ne.s32.totalorder %s2155_s16, %s2156_s13 }
  0xea   : > { %923 = vmatpush.msrb.mxu1 %v846_v20  ;;  %1059 = vmatpush.msra.mxu2 %v804_v40 }
  0xeb   : > { %1032 = vmatpush.msra.mxu0 %v780_v44  ;;  %1016 = vmatpush.msra.mxu3 %v797_v50  ;;  %v1109_v50 = vld [vmem:[#allocation3 + $0x448] sm:$0xff]  ;;  %p2158_p1 = pnand %p2157_p0, %p2299_p5 }
  0xec   : > { %983 = vmatpush.msra.mxu1 %v785_v25  ;;  %1060 = vmatpush.msra.mxu2 %v802_v45 }
  0xed   : > { %1033 = vmatpush.msra.mxu0 %v778_v47  ;;  %1017 = vmatpush.msra.mxu3 %v795_v54  ;;  %v1132_v47 = vld [vmem:[#allocation3 + $0x500] sm:$0xff]  ;;  %v1107_v54 = vld [vmem:[#allocation3 + $0x438] sm:$0xff]  ;;  %p2159_p2 = pneg %p2158_p1 }
  0xee   : > { %984 = vmatpush.msra.mxu1 %v783_v30  ;;  %1061 = vmatpush.msra.mxu2 %v800_v48  ;;  %v1133_v48 = vld [vmem:[#allocation3 + $0x508] sm:$0xff] }
  0xef   : > { %1034 = vmatpush.msra.mxu0 %v776_v51  ;;  %1018 = vmatpush.msra.mxu3 %v793_v58  ;;  %v1130_v51 = vld [vmem:[#allocation3 + $0x4f0] sm:$0xff]  ;;  %v1105_v58 = vld [vmem:[#allocation3 + $0x428] sm:$0xff] }
  0xf0   : > { %985 = vmatpush.msra.mxu1 %v781_v35  ;;  %1062 = vmatpush.msra.mxu2 %v798_v52  ;;  %v1131_v52 = vld [vmem:[#allocation3 + $0x4f8] sm:$0xff] }
  0xf1   : > { %1035 = vmatpush.msra.mxu0 %v774_v55  ;;  %1019 = vmatpush.msra.mxu3 %v791_v62  ;;  %v1128_v55 = vld [vmem:[#allocation3 + $0x4e0] sm:$0xff]  ;;  %v1127_v62 = vld [vmem:[#allocation3 + $0x4d8] sm:$0xff] }
  0xf2   : > { %986 = vmatpush.msra.mxu1 %v779_v42  ;;  %1063 = vmatpush.msra.mxu2 %v796_v56  ;;  %v1129_v56 = vld [vmem:[#allocation3 + $0x4e8] sm:$0xff] }
  0xf3   : > { %1036 = vmatpush.msra.mxu0 %v772_v59  ;;  %1020 = vmatpush.msra.mxu3 %v789_v2  ;;  %v1102_v59 = vld [vmem:[#allocation3 + $0x410] sm:$0xff]  ;;  %v1125_v2 = vld [vmem:[#allocation3 + $0x4c8] sm:$0xff] }
  0xf4   : > { %987 = vmatpush.msra.mxu1 %v777_v37  ;;  %1064 = vmatpush.msra.mxu2 %v794_v60  ;;  %v1110_v37 = vld [vmem:[#allocation3 + $0x450] sm:$0xff]  ;;  %v1103_v60 = vld [vmem:[#allocation3 + $0x418] sm:$0xff] }
  0xf5   : > { %1037 = vmatpush.msra.mxu0 %v770_v63  ;;  %1021 = vmatpush.msra.mxu3 %v787_v7  ;;  %v1100_v63 = vld [vmem:[#allocation3 + $0x400] sm:$0xff]  ;;  %v1097_v7 = vld [vmem:[#allocation3 + $0x3e8] sm:$0xff] }
  0xf6   : > { %988 = vmatpush.msra.mxu1 %v775_v49  ;;  %1065 = vmatpush.msra.mxu2 %v792_v0  ;;  %v1108_v49 = vld [vmem:[#allocation3 + $0x440] sm:$0xff]  ;;  %v1101_v0 = vld [vmem:[#allocation3 + $0x408] sm:$0xff] }
  0xf7   : > { %1038 = vmatpush.msra.mxu0 %v768_v3  ;;  %v1098_v3 = vld [vmem:[#allocation3 + $0x3f0] sm:$0xff] }
  0xf8   : > { %989 = vmatpush.msra.mxu1 %v773_v53  ;;  %1066 = vmatpush.msra.mxu2 %v790_v4  ;;  %v1106_v53 = vld [vmem:[#allocation3 + $0x430] sm:$0xff]  ;;  %v1099_v4 = vld [vmem:[#allocation3 + $0x3f8] sm:$0xff] }
  0xf9   : > { %1039 = vmatpush.msra.mxu0 %v766_v8 }
  0xfa   : > { %990 = vmatpush.msra.mxu1 %v771_v57  ;;  %1067 = vmatpush.msra.mxu2 %v788_v9  ;;  %v1104_v57 = vld [vmem:[#allocation3 + $0x420] sm:$0xff]  ;;  %v1094_v9 = vld [vmem:[#allocation3 + $0x3d0] sm:$0xff] }
  0xfb   : > { %1040 = vmatpush.msra.mxu0 %v764_v11  ;;  %v1095_v11 = vld [vmem:[#allocation3 + $0x3d8] sm:$0xff] }
  0xfc   : > { %991 = vmatpush.msra.mxu1 %v769_v61  ;;  %v1126_v61 = vld [vmem:[#allocation3 + $0x4d0] sm:$0xff] }
  0xfd   : > { %1041 = vmatpush.msra.mxu0 %v762_v14  ;;  %v1092_v14 = vld [vmem:[#allocation3 + $0x3c0] sm:$0xff] }
  0xfe   : > { %992 = vmatpush.msra.mxu1 %v767_v1  ;;  %v1124_v1 = vld [vmem:[#allocation3 + $0x4c0] sm:$0xff] }
  0xff   : > { %1042 = vmatpush.msra.mxu0 %v760_v16  ;;  %v1093_v16 = vld [vmem:[#allocation3 + $0x3c8] sm:$0xff] }
 0x100   : > { %993 = vmatpush.msra.mxu1 %v765_v6  ;;  %v1096_v6 = vld [vmem:[#allocation3 + $0x3e0] sm:$0xff] }
 0x101   : > { %1043 = vmatpush.msra.mxu0 %v758_v23 }
 0x102   : > { %994 = vmatpush.msra.mxu1 %v763_v10 }
 0x103   : > { %1044 = vmatpush.msra.mxu0 %v756_v28  ;;  %v1087_v28 = vld [vmem:[#allocation3 + $0x398] sm:$0xff] }
 0x104   : > { %995 = vmatpush.msra.mxu1 %v761_v13  ;;  %v1122_v13 = vld [vmem:[#allocation3 + $0x4b0] sm:$0xff] }
 0x106   : > { %996 = vmatpush.msra.mxu1 %v759_v15  ;;  %v1121_v15 = vld [vmem:[#allocation3 + $0x4a8] sm:$0xff] }
 0x108   : > { %997 = vmatpush.msra.mxu1 %v757_v21  ;;  %v1088_v21 = vld [vmem:[#allocation3 + $0x3a0] sm:$0xff] }
 0x10a   : > { %998 = vmatpush.msra.mxu1 %v755_v26  ;;  %v1086_v26 = vld [vmem:[#allocation3 + $0x390] sm:$0xff] }
 0x141   : > { %v703_v5 = vpop.permute.xlu0 %702 }
 0x149   : > { %v707_v17 = vpop.permute.xlu1 %706 }
 0x151   : > { %v705_v18 = vpop.permute.xlu0 %704 }
 0x152   : > { %v711_v19 = vsel %vm710_vm4, %v703_v5, %v705_v18  ;;  %v718_v20 = vmax.f32 %v2520_v39, %v705_v18  ;;  %v1123_v5 = vld [vmem:[#allocation3 + $0x4b8] sm:$0xff]  ;;  %v1090_v18 = vld [vmem:[#allocation3 + $0x3b0] sm:$0xff] }
 0x153   : > { %v717_v22 = vmax.f32 %v2510_v12, %v711_v19  ;;  %v1119_v19 = vld [vmem:[#allocation3 + $0x498] sm:$0xff] }
 0x154   : > { %v736_v24 = vrot.slane %v718_v20, 7  ;;  %v1091_v20 = vld [vmem:[#allocation3 + $0x3b8] sm:$0xff] }
 0x155   : > { %v735_v25 = vrot.slane %v717_v22, 7  ;;  %v1118_v22 = vld [vmem:[#allocation3 + $0x490] sm:$0xff] }
 0x156   : > { %747 = vst.msk [vmem:[#allocation2 + $0x8] sm:$0xfe] %vm746_vm5, %v736_v24 }
 0x157   : > { %745 = vst [vmem:[#allocation2] sm:$0xfe] %v735_v25 }
 0x159   : > { %v709_v29 = vpop.permute.xlu1 %708 }
 0x15a   : > { %v712_v39 = vsel %vm710_vm4, %v707_v17, %v709_v29  ;;  %v720_v30 = vmax.f32 %v2524_v46, %v709_v29  ;;  %v1120_v17 = vld [vmem:[#allocation3 + $0x4a0] sm:$0xff] }
 0x15b   : > { %v719_v12 = vmax.f32 %v2514_v27, %v712_v39  ;;  %v1111_v27 = vld [vmem:[#allocation3 + $0x458] sm:$0xff]  ;;  %v1116_v29 = vld [vmem:[#allocation3 + $0x480] sm:$0xff]  ;;  %v1117_v39 = vld [vmem:[#allocation3 + $0x488] sm:$0xff] }
 0x15c   : > { %v739_v31 = vrot.slane %v720_v30, 7 }
 0x15d   : > { %v737_v32 = vrot.slane %v719_v12, 7  ;;  %v810_v35 = vld [vmem:[#allocation2 + $0x8] sm:$0xfe]  ;;  %v1084_v12 = vld [vmem:[#allocation3 + $0x380] sm:$0xff] }
 0x15e   : > { %v740_v33 = vsel %vm734_vm6, %v736_v24, %v739_v31  ;;  %v809_v36 = vld [vmem:[#allocation2] sm:$0xfe]  ;;  %v875_v40 = vrot.slane %v810_v35, 1  ;;  %v752_v10 = vld [vmem:[#allocation2 + $0x8] sm:$0xff] }
 0x15f   : > { %v738_v34 = vsel %vm734_vm6, %v735_v25, %v737_v32  ;;  %750 = vst.msk [vmem:[#allocation2 + $0x18] sm:$0x7f] %vm749_vm7, %v740_v33  ;;  %v872_v44 = vrot.slane %v809_v36, 1  ;;  %v751_v8 = vld [vmem:[#allocation2] sm:$0xff]  ;;  %v1089_v24 = vld [vmem:[#allocation3 + $0x3a8] sm:$0xff]  ;;  %v1114_v33 = vld [vmem:[#allocation3 + $0x470] sm:$0xff] }
 0x160   : > { %748 = vst [vmem:[#allocation2 + $0x10] sm:$0x7f] %v738_v34  ;;  %v1085_v31 = vld [vmem:[#allocation3 + $0x388] sm:$0xff]  ;;  %v1115_v34 = vld [vmem:[#allocation3 + $0x478] sm:$0xff]  ;;  %v1082_v36 = vld [vmem:[#allocation3 + $0x370] sm:$0xff] }
 0x161   : > { %v1076_v35 = vld [vmem:[#allocation2 + $0x8] sm:$0xfc] }
 0x166   : > { %v812_v38 = vld [vmem:[#allocation2 + $0x18] sm:$0x7f] }
 0x167   : > { %v876_v42 = vrot.slane %v812_v38, 1  ;;  %v811_v43 = vld [vmem:[#allocation2 + $0x10] sm:$0x7f]  ;;  %v754_v25 = vld [vmem:[#allocation2 + $0x18] sm:$0x3f] }
 0x168   : > { %v873_v45 = vrot.slane %v811_v43, 1  ;;  %v753_v23 = vld [vmem:[#allocation2 + $0x10] sm:$0x3f]  ;;  %v1078_v30 = vld [vmem:[#allocation2 + $0x18] sm:$0xff]  ;;  %v1112_v43 = vld [vmem:[#allocation3 + $0x460] sm:$0xff] }
 0x169   : > { %v877_v46 = vsel %vm459_vm2, %v875_v40, %v876_v42  ;;  %v1077_v32 = vld [vmem:[#allocation2 + $0x10] sm:$0xff]  ;;  %v1083_v38 = vld [vmem:[#allocation3 + $0x378] sm:$0xff]  ;;  %v1075_v40 = vld [vmem:[#allocation2] sm:$0xfc] }
 0x16a   : > { %1979 = vmatmul.msk.f32.vlgmr.msrb.gmra.mxu1 %vm880_vm8, %v877_v46  ;;  %1981 = vmatmul.msk.f32.vlgmr.msrb.gmra.mxu3 %vm880_vm8, %v877_v46  ;;  %v874_v41 = vsel %vm459_vm2, %v872_v44, %v873_v45  ;;  %v1139_v44 = vrot.slane %v1077_v32, 2  ;;  %v1080_v46 = vld [vmem:[#allocation3 + $0x360] sm:$0xff] }
 0x16b   : > { %901 = vmatmul.f32.vlgmr.msrb.gmra.mxu0 %v874_v41  ;;  %947 = vmatmul.f32.vlgmr.msrb.gmra.mxu2 %v874_v41  ;;  %v1081_v41 = vld [vmem:[#allocation3 + $0x368] sm:$0xff]  ;;  %v1312_v32 = vld [vmem:[#allocation6 + $0x50] sm:$0xff] }
 0x16c   : > { %1150 = vmatpush.msrb.mxu3 %v1110_v37  ;;  %1196 = vmatpush.msrb.mxu2 %v1111_v27  ;;  %v1141_v37 = vrot.slane %v1076_v35, 2  ;;  %v1138_v27 = vrot.slane %v1075_v40, 2  ;;  %v1386_v40 = vld [vmem:[#allocation6 + $0x130] sm:$0xff] }
 0x16d   : > { %1178 = vmatpush.msrb.mxu1 %v1132_v47  ;;  %1224 = vmatpush.msrb.mxu0 %v1133_v48 }
 0x16e   : > { %1151 = vmatpush.msrb.mxu3 %v1108_v49  ;;  %1197 = vmatpush.msrb.mxu2 %v1109_v50  ;;  %v1140_v48 = vsel %vm339_vm0, %v1138_v27, %v1139_v44  ;;  %v1311_v27 = vld [vmem:[#allocation6 + $0x48] sm:$0xff] }
 0x16f   : > { %1179 = vmatpush.msrb.mxu1 %v1130_v51  ;;  %1225 = vmatpush.msrb.mxu0 %v1131_v52 }
 0x170   : > { %1152 = vmatpush.msrb.mxu3 %v1106_v53  ;;  %1198 = vmatpush.msrb.mxu2 %v1107_v54 }
 0x171   : > { %1180 = vmatpush.msrb.mxu1 %v1128_v55  ;;  %1226 = vmatpush.msrb.mxu0 %v1129_v56 }
 0x172   : > { %1153 = vmatpush.msrb.mxu3 %v1104_v57  ;;  %1980 = vmatmul.msk.f32.gmra.mxu1 %vm880_vm8, %v876_v42 }
 0x173   : > { %1982 = vmatmul.msk.f32.gmra.mxu3 %vm880_vm8, %v876_v42  ;;  %1199 = vmatpush.msrb.mxu2 %v1105_v58  ;;  %v1142_v42 = vrot.slane %v1078_v30, 2  ;;  %v1398_v30 = vld [vmem:[#allocation6 + $0x190] sm:$0xff] }
 0x174   : > { %904 = vmatmul.f32.gmra.mxu0 %v873_v45  ;;  %950 = vmatmul.f32.gmra.mxu2 %v873_v45  ;;  %v1113_v45 = vld [vmem:[#allocation3 + $0x468] sm:$0xff] }
 0x175   : > { %1154 = vmatpush.msrb.mxu3 %v1102_v59  ;;  %1200 = vmatpush.msrb.mxu2 %v1103_v60  ;;  %v1143_v47 = vsel %vm339_vm0, %v1141_v37, %v1142_v42 }
 0x176   : > { %1181 = vmatpush.msrb.mxu1 %v1126_v61  ;;  %1227 = vmatpush.msrb.mxu0 %v1127_v62 }
 0x177   : > { %1155 = vmatpush.msrb.mxu3 %v1100_v63  ;;  %1201 = vmatpush.msrb.mxu2 %v1101_v0 }
 0x178   : > { %1182 = vmatpush.msrb.mxu1 %v1124_v1  ;;  %1228 = vmatpush.msrb.mxu0 %v1125_v2 }
 0x179   : > { %1156 = vmatpush.msrb.mxu3 %v1098_v3  ;;  %1202 = vmatpush.msrb.mxu2 %v1099_v4  ;;  %v1317_v3 = vld [vmem:[#allocation6 + $0x78] sm:$0xff]  ;;  %v1316_v4 = vld [vmem:[#allocation6 + $0x70] sm:$0xff] }
 0x17a   : > { %999 = vmatmul.f32.vlgmr.msra.gmra.mxu1 %v751_v8  ;;  %1229 = vmatpush.msrb.mxu0 %v1123_v5  ;;  %v1327_v5 = vld [vmem:[#allocation6 + $0xc8] sm:$0xff] }
 0x17b   : > { %1157 = vmatpush.msrb.mxu3 %v1096_v6  ;;  %1203 = vmatpush.msrb.mxu2 %v1097_v7 }
 0x17c   : > { %1983 = vmatmul.msk.f32.vlgmr.msra.gmra.mxu3 %vm880_vm8, %v752_v10  ;;  %1045 = vmatmul.f32.vlgmr.msra.gmra.mxu0 %v751_v8  ;;  %v1326_v8 = vld [vmem:[#allocation6 + $0xc0] sm:$0xff] }
 0x17d   : > { %1985 = vmatmul.msk.f32.vlgmr.msra.gmra.mxu2 %vm880_vm8, %v752_v10  ;;  %1158 = vmatpush.msrb.mxu3 %v1094_v9  ;;  %v1315_v10 = vld [vmem:[#allocation6 + $0x68] sm:$0xff] }
 0x17e   : > { %1204 = vmatpush.msrb.mxu2 %v1095_v11  ;;  %1183 = vmatpush.msrb.mxu1 %v1122_v13  ;;  %v1325_v11 = vld [vmem:[#allocation6 + $0xb8] sm:$0xff] }
 0x17f   : > { %1159 = vmatpush.msrb.mxu3 %v1092_v14  ;;  %1230 = vmatpush.msrb.mxu0 %v1121_v15  ;;  %v2553_v14 = vld [vmem:[%s2641_s4] sm:$0x3] }
 0x180   : > { %1205 = vmatpush.msrb.mxu2 %v1093_v16  ;;  %1184 = vmatpush.msrb.mxu1 %v1120_v17  ;;  %v1314_v16 = vld [vmem:[#allocation6 + $0x60] sm:$0xff]  ;;  %v1324_v17 = vld [vmem:[#allocation6 + $0xb0] sm:$0xff] }
 0x181   : > { %1160 = vmatpush.msrb.mxu3 %v1090_v18  ;;  %1231 = vmatpush.msrb.mxu0 %v1119_v19  ;;  %v1389_v18 = vld [vmem:[#allocation6 + $0x148] sm:$0xff] }
 0x182   : > { %1206 = vmatpush.msrb.mxu2 %v1091_v20  ;;  %1002 = vmatmul.f32.gmra.mxu1 %v753_v23  ;;  %v1388_v20 = vld [vmem:[#allocation6 + $0x140] sm:$0xff] }
 0x183   : > { %1161 = vmatpush.msrb.mxu3 %v1088_v21  ;;  %1185 = vmatpush.msrb.mxu1 %v1118_v22 }
 0x184   : > { %1984 = vmatmul.msk.f32.gmra.mxu3 %vm880_vm8, %v754_v25  ;;  %1207 = vmatpush.msrb.mxu2 %v1089_v24  ;;  %v1323_v24 = vld [vmem:[#allocation6 + $0xa8] sm:$0xff] }
 0x185   : > { %1048 = vmatmul.f32.gmra.mxu0 %v753_v23  ;;  %1986 = vmatmul.msk.f32.gmra.mxu2 %vm880_vm8, %v754_v25  ;;  %v1313_v23 = vld [vmem:[#allocation6 + $0x58] sm:$0xff] }
 0x186   : > { %1162 = vmatpush.msrb.mxu3 %v1086_v26  ;;  %1208 = vmatpush.msrb.mxu2 %v1087_v28  ;;  %v1399_v25 = vld [vmem:[#allocation6 + $0x198] sm:$0xff] }
 0x187   : > { %1186 = vmatpush.msrb.mxu1 %v1116_v29  ;;  %1232 = vmatpush.msrb.mxu0 %v1117_v39  ;;  %v1249_v29 = vperm.slane %v2553_v14, 1  ;;  %v1387_v39 = vld [vmem:[#allocation6 + $0x138] sm:$0xff] }
 0x188   : > { %1163 = vmatpush.msrb.mxu3 %v1084_v12  ;;  %1209 = vmatpush.msrb.mxu2 %v1085_v31 }
 0x189   : > { %1187 = vmatpush.msrb.mxu1 %v1114_v33  ;;  %1233 = vmatpush.msrb.mxu0 %v1115_v34  ;;  %v1322_v33 = vld [vmem:[#allocation6 + $0xa0] sm:$0xff] }
 0x18a   : > { %1164 = vmatpush.msrb.mxu3 %v1082_v36  ;;  %1210 = vmatpush.msrb.mxu2 %v1083_v38 }
 0x18b   : > { %1188 = vmatpush.msrb.mxu1 %v1112_v43  ;;  %1234 = vmatpush.msrb.mxu0 %v1113_v45 }
 0x18c   : > { %1165 = vmatpush.msrb.mxu3 %v1080_v46  ;;  %1987 = vmatmul.msk.f32.vlgmr.msrb.gmra.mxu1 %vm880_vm8, %v1143_v47 }
 0x18d   : > { %1166 = vmatmul.f32.vlgmr.msrb.gmra.mxu3 %v1140_v48  ;;  %1211 = vmatpush.msrb.mxu2 %v1081_v41  ;;  %v1321_v41 = vld [vmem:[#allocation6 + $0x98] sm:$0xff] }
 0x18e   : > { %1212 = vmatmul.f32.vlgmr.msrb.gmra.mxu2 %v1140_v48  ;;  %1989 = vmatmul.msk.f32.vlgmr.msrb.gmra.mxu0 %vm880_vm8, %v1143_v47 }
 0x18f   : > { %1332 = vmatpush.msra.mxu1 %v1317_v3  ;;  %1358 = vmatpush.msra.mxu3 %v1327_v5  ;;  %v1318_v5 = vld [vmem:[#allocation6 + $0x80] sm:$0xff] }
 0x190   : > { %1406 = vmatpush.msra.mxu0 %v1389_v18  ;;  %1432 = vmatpush.msra.mxu2 %v1399_v25  ;;  %v1306_v18 = vld [vmem:[#allocation6 + $0x20] sm:$0xff]  ;;  %v1381_v25 = vld [vmem:[#allocation6 + $0x108] sm:$0xff] }
 0x191   : > { %1333 = vmatpush.msra.mxu1 %v1316_v4  ;;  %1359 = vmatpush.msra.mxu3 %v1326_v8  ;;  %v1308_v4 = vld [vmem:[#allocation6 + $0x30] sm:$0xff]  ;;  %v1463_v8 = vld [vmem:[#allocation6 + $0x218] sm:$0xff] }
 0x192   : > { %1407 = vmatpush.msra.mxu0 %v1388_v20  ;;  %1433 = vmatpush.msra.mxu2 %v1398_v30 }
 0x193   : > { %1334 = vmatpush.msra.mxu1 %v1315_v10  ;;  %1360 = vmatpush.msra.mxu3 %v1325_v11  ;;  %v1307_v11 = vld [vmem:[#allocation6 + $0x28] sm:$0xff] }
 0x194   : > { %1988 = vmatmul.msk.f32.gmra.mxu1 %vm880_vm8, %v1142_v42  ;;  %1408 = vmatpush.msra.mxu0 %v1387_v39  ;;  %v1380_v39 = vld [vmem:[#allocation6 + $0x100] sm:$0xff] }
 0x195   : > { %1169 = vmatmul.f32.gmra.mxu3 %v1139_v44  ;;  %1335 = vmatpush.msra.mxu1 %v1314_v16  ;;  %v1462_v16 = vld [vmem:[#allocation6 + $0x210] sm:$0xff] }
 0x196   : > { %1215 = vmatmul.f32.gmra.mxu2 %v1139_v44  ;;  %1990 = vmatmul.msk.f32.gmra.mxu0 %vm880_vm8, %v1142_v42  ;;  %v1397_v42 = vld [vmem:[#allocation6 + $0x188] sm:$0xff] }
 0x197   : > { %1361 = vmatpush.msra.mxu3 %v1324_v17  ;;  %1336 = vmatpush.msra.mxu1 %v1313_v23 }
 0x198   : > { %1409 = vmatpush.msra.mxu0 %v1386_v40  ;;  %1434 = vmatpush.msra.mxu2 %v1397_v42  ;;  %v1378_v40 = vld [vmem:[#allocation6 + $0xf0] sm:$0xff]  ;;  %v1536_v42 = vld [vmem:[#allocation6 + $0x2e8] sm:$0xff] }
 0x199   : > { %1362 = vmatpush.msra.mxu3 %v1323_v24  ;;  %1337 = vmatpush.msra.mxu1 %v1312_v32  ;;  %v1305_v24 = vld [vmem:[#allocation6 + $0x18] sm:$0xff]  ;;  %v1303_v32 = vld [vmem:[#allocation6 + $0x8] sm:$0xff] }
 0x19b   : > { %1363 = vmatpush.msra.mxu3 %v1322_v33  ;;  %1338 = vmatpush.msra.mxu1 %v1311_v27  ;;  %v1379_v33 = vld [vmem:[#allocation6 + $0xf8] sm:$0xff]  ;;  %v1456_v27 = vld [vmem:[#allocation6 + $0x1e0] sm:$0xff] }
 0x19d   : > { %1364 = vmatpush.msra.mxu3 %v1321_v41  ;;  %v1472_v41 = vld [vmem:[#allocation6 + $0x260] sm:$0xff] }
 0x1e7   : > { %v925_v49 = vpop.f32.mrf.mxu1 }
 0x1e8   : > { %v902_v50 = vpop.f32.mrf.mxu0 }
 0x1e9   : > { %v926_v21 = vadd.f32 %v925_v49, %v902_v50  ;;  %v1385_v50 = vld [vmem:[#allocation6 + $0x128] sm:$0xff] }
 0x1ea   : > { %1410 = vmatpush.msra.mxu0 %v1385_v50  ;;  %v1471_v50 = vld [vmem:[#allocation6 + $0x258] sm:$0xff] }
 0x1ed   : > { %v971_v51 = vpop.f32.mrf.mxu3 }
 0x1ee   : > { %v948_v52 = vpop.f32.mrf.mxu2 }
 0x1ef   : > { %v928_v53 = vpop.f32.mrf.mxu1  ;;  %v972_v6 = vadd.f32 %v971_v51, %v948_v52  ;;  %v1396_v51 = vld [vmem:[#allocation6 + $0x180] sm:$0xff]  ;;  %v1248_v52 = vperm.slane %v2553_v14, 0 }
 0x1f0   : > { %1435 = vmatpush.msra.mxu2 %v1396_v51  ;;  %v1533_v51 = vld [vmem:[#allocation6 + $0x2d0] sm:$0xff] }
 0x1f1   : > { %v905_v54 = vpop.f32.mrf.mxu0 }
 0x1f2   : > { %v929_v22 = vadd.f32 %v928_v53, %v905_v54  ;;  %v1310_v54 = vld [vmem:[#allocation6 + $0x40] sm:$0xff] }
 0x1f3   : > { %1339 = vmatpush.msra.mxu1 %v1310_v54  ;;  %v1470_v54 = vld [vmem:[#allocation6 + $0x250] sm:$0xff] }
 0x1f6   : > { %v974_v55 = vpop.f32.mrf.mxu3 }
 0x1f7   : > { %v951_v56 = vpop.f32.mrf.mxu2  ;;  %v1000_v57 = vpop.f32.mrf.mxu1 }
 0x1f8   : > { %v975_v26 = vadd.f32 %v974_v55, %v951_v56  ;;  %v1001_v12 = vadd.f32 %v1000_v57, %v926_v21  ;;  %v1320_v55 = vld [vmem:[#allocation6 + $0x90] sm:$0xff] }
 0x1f9   : > { %v1046_v58 = vpop.f32.mrf.mxu0  ;;  %1365 = vmatpush.msra.mxu3 %v1320_v55  ;;  %v1532_v55 = vld [vmem:[#allocation6 + $0x2c8] sm:$0xff] }
 0x1fa   : > { %v1047_v13 = vadd.f32 %v1046_v58, %v972_v6  ;;  %v1384_v58 = vld [vmem:[#allocation6 + $0x120] sm:$0xff] }
 0x1fb   : > { %1411 = vmatpush.msra.mxu0 %v1384_v58  ;;  %v1469_v58 = vld [vmem:[#allocation6 + $0x248] sm:$0xff] }
 0x1ff   : > { %v1023_v59 = vpop.f32.mrf.mxu3  ;;  %v1003_v61 = vpop.f32.mrf.mxu1 }
 0x200   : > { %v1069_v60 = vpop.f32.mrf.mxu2  ;;  %v1004_v31 = vadd.f32 %v1003_v61, %v929_v22  ;;  %v1024_v43 = vadd.f32 %v1023_v59, %v1001_v12  ;;  %v1395_v59 = vld [vmem:[#allocation6 + $0x178] sm:$0xff]  ;;  %v1461_v22 = vld [vmem:[#allocation6 + $0x208] sm:$0xff] }
 0x201   : > { %v1070_v19 = vadd.f32 %v1069_v60, %v1047_v13  ;;  %v1309_v61 = vld [vmem:[#allocation6 + $0x38] sm:$0xff]  ;;  %1436 = vmatpush.msra.mxu2 %v1395_v59  ;;  %v1393_v13 = vld [vmem:[#allocation6 + $0x168] sm:$0xff]  ;;  %v1531_v59 = vld [vmem:[#allocation6 + $0x2c0] sm:$0xff] }
 0x202   : > { %v1049_v62 = vpop.f32.mrf.mxu0  ;;  %1340 = vmatpush.msra.mxu1 %v1309_v61  ;;  %v1459_v12 = vld [vmem:[#allocation6 + $0x1f8] sm:$0xff]  ;;  %v1452_v61 = vld [vmem:[#allocation6 + $0x1c0] sm:$0xff] }
 0x203   : > { %v1050_v34 = vadd.f32 %v1049_v62, %v975_v26  ;;  %v1319_v62 = vld [vmem:[#allocation6 + $0x88] sm:$0xff]  ;;  %v1460_v26 = vld [vmem:[#allocation6 + $0x200] sm:$0xff] }
 0x204   : > { %1366 = vmatpush.msra.mxu3 %v1319_v62  ;;  %1341 = vmatpush.msra.mxu1 %v1308_v4  ;;  %v1468_v62 = vld [vmem:[#allocation6 + $0x240] sm:$0xff]  ;;  %v1544_v4 = vld [vmem:[#allocation6 + $0x328] sm:$0xff] }
 0x206   : > { %1367 = vmatpush.msra.mxu3 %v1318_v5  ;;  %1342 = vmatpush.msra.mxu1 %v1307_v11  ;;  %v1450_v5 = vld [vmem:[#allocation6 + $0x1b0] sm:$0xff]  ;;  %v1543_v11 = vld [vmem:[#allocation6 + $0x320] sm:$0xff] }
 0x207   : > { %v1026_v63 = vpop.f32.mrf.mxu3 }
 0x208   : > { %v1072_v0 = vpop.f32.mrf.mxu2  ;;  %v1027_v44 = vadd.f32 %v1026_v63, %v1004_v31  ;;  %1479 = vmatpush.msrb.mxu3 %v1463_v8  ;;  %1343 = vmatpush.msra.mxu1 %v1306_v18  ;;  %v1391_v31 = vld [vmem:[#allocation6 + $0x158] sm:$0xff]  ;;  %v1449_v8 = vld [vmem:[#allocation6 + $0x1a8] sm:$0xff]  ;;  %v1464_v18 = vld [vmem:[#allocation6 + $0x220] sm:$0xff] }
 0x209   : > { %v1190_v1 = vpop.f32.mrf.mxu1  ;;  %v1073_v47 = vadd.f32 %v1072_v0, %v1050_v34 }
 0x20a   : > { %1480 = vmatpush.msrb.mxu3 %v1462_v16  ;;  %1344 = vmatpush.msra.mxu1 %v1305_v24  ;;  %v1542_v16 = vld [vmem:[#allocation6 + $0x318] sm:$0xff]  ;;  %v1540_v24 = vld [vmem:[#allocation6 + $0x308] sm:$0xff] }
 0x20b   : > { %v1236_v2 = vpop.f32.mrf.mxu0 }
 0x20c   : > { %1481 = vmatpush.msrb.mxu3 %v1461_v22  ;;  %v1523_v22 = vld [vmem:[#allocation6 + $0x280] sm:$0xff] }
 0x20e   : > { %1482 = vmatpush.msrb.mxu3 %v1460_v26  ;;  %v1539_v26 = vld [vmem:[#allocation6 + $0x300] sm:$0xff] }
 0x210   : > { %v1167_v7 = vpop.f32.mrf.mxu3  ;;  %1483 = vmatpush.msrb.mxu3 %v1459_v12 }
 0x211   : > { %v1213_v9 = vpop.f32.mrf.mxu2  ;;  %v1191_v35 = vadd.f32 %v1190_v1, %v1167_v7  ;;  %v1193_v36 = vpop.f32.mrf.mxu1  ;;  %v1383_v1 = vld [vmem:[#allocation6 + $0x118] sm:$0xff] }
 0x212   : > { %v1237_v15 = vadd.f32 %v1236_v2, %v1213_v9  ;;  %v1394_v2 = vld [vmem:[#allocation6 + $0x170] sm:$0xff]  ;;  %1412 = vmatpush.msra.mxu0 %v1383_v1  ;;  %v1451_v1 = vld [vmem:[#allocation6 + $0x1b8] sm:$0xff] }
 0x213   : > { %v1239_v45 = vpop.f32.mrf.mxu0  ;;  %v1242_v56 = vadd.f32 %v1191_v35, %v1024_v43  ;;  %v1382_v9 = vld [vmem:[#allocation6 + $0x110] sm:$0xff]  ;;  %1437 = vmatpush.msra.mxu2 %v1394_v2  ;;  %v1467_v2 = vld [vmem:[#allocation6 + $0x238] sm:$0xff] }
 0x214   : > { %v1243_v28 = vadd.f32 %v1237_v15, %v1070_v19  ;;  %1413 = vmatpush.msra.mxu0 %v1382_v9  ;;  %v1458_v35 = vld [vmem:[#allocation6 + $0x1f0] sm:$0xff]  ;;  %v1527_v9 = vld [vmem:[#allocation6 + $0x2a0] sm:$0xff] }
 0x215   : > { %v1252_v6 = vadd.f32 %v1248_v52, %v1242_v56  ;;  %1438 = vmatpush.msra.mxu2 %v1393_v13  ;;  %1484 = vmatpush.msrb.mxu3 %v1458_v35  ;;  %v1374_v56 = vld [vmem:[#allocation6 + $0xd0] sm:$0xff]  ;;  %v1448_v13 = vld [vmem:[#allocation6 + $0x1a0] sm:$0xff] }
 0x216   : > { %v1253_v49 = vadd.f32 %v1249_v29, %v1243_v28  ;;  %v1392_v28 = vld [vmem:[#allocation6 + $0x160] sm:$0xff]  ;;  %1414 = vmatpush.msra.mxu0 %v1381_v25  ;;  %v1522_v25 = vld [vmem:[#allocation6 + $0x278] sm:$0xff]  ;;  %v1608_v35 = vld [vmem:[#allocation6 + $0x3b0] sm:$0xff] }
 0x217   : > { %v1256_v19 = vmax.f32 %v1252_v6, 0.0  ;;  %1439 = vmatpush.msra.mxu2 %v1392_v28  ;;  %v1466_v6 = vld [vmem:[#allocation6 + $0x230] sm:$0xff] }
 0x218   : > { %v1170_v38 = vpop.f32.mrf.mxu3  ;;  %v1257_v0 = vmax.f32 %v1253_v49, 0.0  ;;  %1415 = vmatpush.msra.mxu0 %v1380_v39  ;;  %v1455_v49 = vld [vmem:[#allocation6 + $0x1d8] sm:$0xff]  ;;  %v1521_v28 = vld [vmem:[#allocation6 + $0x270] sm:$0xff] }
 0x219   : > { %v1194_v46 = vadd.f32 %v1193_v36, %v1170_v38  ;;  %v1216_v37 = vpop.f32.mrf.mxu2  ;;  %v1264_v30 = vrot.slane %v1256_v19, 1  ;;  %v1390_v36 = vld [vmem:[#allocation6 + $0x150] sm:$0xff]  ;;  %v1302_v38 = vld [vmem:[#allocation6] sm:$0xff]  ;;  %1440 = vmatpush.msra.mxu2 %v1391_v31  ;;  %v1619_v31 = vld [vmem:[#allocation6 + $0x408] sm:$0xff] }
 0x21a   : > { %v1240_v48 = vadd.f32 %v1239_v45, %v1216_v37  ;;  %v1267_v15 = vrot.slane %v1257_v0, 1  ;;  %1416 = vmatpush.msra.mxu0 %v1379_v33  ;;  %v1473_v45 = vld [vmem:[#allocation6 + $0x268] sm:$0xff]  ;;  %v1537_v39 = vld [vmem:[#allocation6 + $0x2f0] sm:$0xff]  ;;  %v1609_v33 = vld [vmem:[#allocation6 + $0x3b8] sm:$0xff] }
 0x21b   : > { %v1244_v53 = vadd.f32 %v1194_v46, %v1027_v44  ;;  %v1457_v44 = vld [vmem:[#allocation6 + $0x1e8] sm:$0xff]  ;;  %1441 = vmatpush.msra.mxu2 %v1390_v36  ;;  %v1535_v46 = vld [vmem:[#allocation6 + $0x2e0] sm:$0xff]  ;;  %v1617_v36 = vld [vmem:[#allocation6 + $0x3f8] sm:$0xff] }
 0x21c   : > { %v1245_v57 = vadd.f32 %v1240_v48, %v1073_v47  ;;  %1417 = vmatpush.msra.mxu0 %v1378_v40  ;;  %v1377_v37 = vld [vmem:[#allocation6 + $0xe8] sm:$0xff]  ;;  %1485 = vmatpush.msrb.mxu3 %v1457_v44  ;;  %v1534_v47 = vld [vmem:[#allocation6 + $0x2d8] sm:$0xff]  ;;  %v1376_v48 = vld [vmem:[#allocation6 + $0xe0] sm:$0xff] }
 0x21d   : > { %v1254_v60 = vadd.f32 %v1248_v52, %v1244_v53  ;;  %1505 = vmatpush.msrb.mxu2 %v1473_v45  ;;  %v1375_v52 = vld [vmem:[#allocation6 + $0xd8] sm:$0xff]  ;;  %v1454_v53 = vld [vmem:[#allocation6 + $0x1d0] sm:$0xff]  ;;  %v1606_v44 = vld [vmem:[#allocation6 + $0x3a0] sm:$0xff] }
 0x21e   : > { %v1255_v63 = vadd.f32 %v1249_v29, %v1245_v57  ;;  %v1304_v29 = vld [vmem:[#allocation6 + $0x10] sm:$0xff]  ;;  %1418 = vmatpush.msra.mxu0 %v1377_v37  ;;  %1486 = vmatpush.msrb.mxu3 %v1456_v27  ;;  %v1453_v57 = vld [vmem:[#allocation6 + $0x1c8] sm:$0xff]  ;;  %v1690_v27 = vld [vmem:[#allocation6 + $0x4d8] sm:$0xff] }
 0x21f   : > { %v1258_v3 = vmax.f32 %v1254_v60, 0.0  ;;  %1345 = vmatpush.msra.mxu1 %v1304_v29  ;;  %1506 = vmatpush.msrb.mxu2 %v1472_v41  ;;  %v1546_v60 = vld [vmem:[#allocation6 + $0x338] sm:$0xff]  ;;  %v1616_v40 = vld [vmem:[#allocation6 + $0x3f0] sm:$0xff]  ;;  %v1615_v45 = vld [vmem:[#allocation6 + $0x3e8] sm:$0xff] }
 0x220   : > { %v1259_v7 = vmax.f32 %v1255_v63, 0.0  ;;  %1419 = vmatpush.msra.mxu0 %v1376_v48  ;;  %1487 = vmatpush.msrb.mxu3 %v1455_v49  ;;  %v1530_v63 = vld [vmem:[#allocation6 + $0x2b8] sm:$0xff] }
 0x221   : > { %v1265_v10 = vrot.slane %v1258_v3, 1  ;;  %1346 = vmatpush.msra.mxu1 %v1303_v32  ;;  %1507 = vmatpush.msrb.mxu2 %v1471_v50  ;;  %v1538_v29 = vld [vmem:[#allocation6 + $0x2f8] sm:$0xff]  ;;  %v1680_v50 = vld [vmem:[#allocation6 + $0x488] sm:$0xff] }
 0x222   : > { %v1268_v14 = vrot.slane %v1259_v7, 1  ;;  %1420 = vmatpush.msra.mxu0 %v1375_v52  ;;  %1488 = vmatpush.msrb.mxu3 %v1454_v53  ;;  %v1605_v41 = vld [vmem:[#allocation6 + $0x398] sm:$0xff]  ;;  %v1604_v52 = vld [vmem:[#allocation6 + $0x390] sm:$0xff]  ;;  %v1679_v53 = vld [vmem:[#allocation6 + $0x480] sm:$0xff] }
 0x223   : > { %v2557_v17 = vmax.f32 %v1258_v3, %v1265_v10  ;;  %v1266_v34 = vsel %vm459_vm2, %v1264_v30, %v1265_v10  ;;  %1347 = vmatpush.msra.mxu1 %v1302_v38  ;;  %1508 = vmatpush.msrb.mxu2 %v1470_v54  ;;  %v1529_v3 = vld [vmem:[#allocation6 + $0x2b0] sm:$0xff]  ;;  %v1526_v10 = vld [vmem:[#allocation6 + $0x298] sm:$0xff]  ;;  %v1607_v38 = vld [vmem:[#allocation6 + $0x3a8] sm:$0xff] }
 0x224   : > { %v2559_v20 = vmax.f32 %v1259_v7, %v1268_v14  ;;  %v1269_v21 = vsel %vm459_vm2, %v1267_v15, %v1268_v14  ;;  %v2571_v43 = vmax.f32 %v1256_v19, %v1266_v34  ;;  %1421 = vmatpush.msra.mxu0 %v1374_v56  ;;  %1489 = vmatpush.msrb.mxu3 %v1453_v57  ;;  %v1528_v7 = vld [vmem:[#allocation6 + $0x2a8] sm:$0xff]  ;;  %v1525_v15 = vld [vmem:[#allocation6 + $0x290] sm:$0xff]  ;;  %v1618_v34 = vld [vmem:[#allocation6 + $0x400] sm:$0xff] }
 0x225   : > { %1286 = vrot.lane.b32.xlu0 %v2557_v17, %s2220_s18  ;;  %v2564_v23 = vmax.f32 %v1257_v0, %v1269_v21  ;;  %1552 = vmatpush.msrb.mxu1 %v1536_v42  ;;  %v1545_v0 = vld [vmem:[#allocation6 + $0x330] sm:$0xff]  ;;  %v1465_v14 = vld [vmem:[#allocation6 + $0x228] sm:$0xff]  ;;  %v1678_v57 = vld [vmem:[#allocation6 + $0x478] sm:$0xff] }
 0x226   : > { %1288 = vrot.lane.b32.xlu1 %v2559_v20, %s2220_s18  ;;  %1509 = vmatpush.msrb.mxu2 %v1469_v58  ;;  %v1524_v19 = vld [vmem:[#allocation6 + $0x288] sm:$0xff]  ;;  %v1541_v21 = vld [vmem:[#allocation6 + $0x310] sm:$0xff]  ;;  %v1687_v58 = vld [vmem:[#allocation6 + $0x4c0] sm:$0xff] }
 0x227   : > { %1284 = vrot.lane.b32.xlu2 %v2564_v23, %s2220_s18  ;;  %1553 = vmatpush.msrb.mxu1 %v1535_v46  ;;  %v1688_v54 = vld [vmem:[#allocation6 + $0x4c8] sm:$0xff]  ;;  %v1612_v56 = vld [vmem:[#allocation6 + $0x3d0] sm:$0xff] }
 0x228   : > { %1578 = vmatpush.msrb.mxu0 %v1546_v60  ;;  %1490 = vmatpush.msrb.mxu3 %v1452_v61  ;;  %v1611_v60 = vld [vmem:[#allocation6 + $0x3c8] sm:$0xff] }
 0x229   : > { %1554 = vmatpush.msrb.mxu1 %v1534_v47  ;;  %1510 = vmatpush.msrb.mxu2 %v1468_v62  ;;  %v1614_v47 = vld [vmem:[#allocation6 + $0x3e0] sm:$0xff]  ;;  %v1677_v62 = vld [vmem:[#allocation6 + $0x470] sm:$0xff] }
 0x22a   : > { %1579 = vmatpush.msrb.mxu0 %v1545_v0  ;;  %1491 = vmatpush.msrb.mxu3 %v1451_v1  ;;  %v1601_v0 = vld [vmem:[#allocation6 + $0x378] sm:$0xff]  ;;  %v1610_v1 = vld [vmem:[#allocation6 + $0x3c0] sm:$0xff] }
 0x22b   : > { %1555 = vmatpush.msrb.mxu1 %v1533_v51  ;;  %1511 = vmatpush.msrb.mxu2 %v1467_v2  ;;  %v1689_v51 = vld [vmem:[#allocation6 + $0x4d0] sm:$0xff] }
 0x22c   : > { %1580 = vmatpush.msrb.mxu0 %v1544_v4  ;;  %1492 = vmatpush.msrb.mxu3 %v1450_v5  ;;  %v1685_v2 = vld [vmem:[#allocation6 + $0x4b0] sm:$0xff]  ;;  %v1676_v4 = vld [vmem:[#allocation6 + $0x468] sm:$0xff]  ;;  %v1754_v5 = vld [vmem:[#allocation6 + $0x558] sm:$0xff] }
 0x22d   : > { %1556 = vmatpush.msrb.mxu1 %v1532_v55  ;;  %1512 = vmatpush.msrb.mxu2 %v1466_v6  ;;  %v1603_v55 = vld [vmem:[#allocation6 + $0x388] sm:$0xff] }
 0x22e   : > { %1493 = vmatpush.msrb.mxu3 %v1449_v8  ;;  %1581 = vmatpush.msrb.mxu0 %v1543_v11  ;;  %v1684_v8 = vld [vmem:[#allocation6 + $0x4a8] sm:$0xff]  ;;  %v1753_v11 = vld [vmem:[#allocation6 + $0x550] sm:$0xff] }
 0x22f   : > { %1282 = vrot.lane.b32.xlu2 %v2571_v43, %s2220_s18  ;;  %1557 = vmatpush.msrb.mxu1 %v1531_v59  ;;  %v1602_v59 = vld [vmem:[#allocation6 + $0x380] sm:$0xff]  ;;  %s2160_s18 = scalar_lea.hbm %s2644_s7, 2 }
 0x230   : > { %1494 = vmatpush.msrb.mxu3 %v1448_v13  ;;  %1513 = vmatpush.msrb.mxu2 %v1465_v14  ;;  %v1599_v13 = vld [vmem:[#allocation6 + $0x368] sm:$0xff]  ;;  %v1674_v14 = vld [vmem:[#allocation6 + $0x458] sm:$0xff]  ;;  %p2162_p4 = scmp.lt.s32.totalorder %s2160_s18, %s2156_s13 }
 0x231   : > { %1558 = vmatpush.msrb.mxu1 %v1530_v63  ;;  %1582 = vmatpush.msrb.mxu0 %v1542_v16  ;;  %v1686_v63 = vld [vmem:[#allocation6 + $0x4b8] sm:$0xff]  ;;  %v1752_v16 = vld [vmem:[#allocation6 + $0x548] sm:$0xff] }
 0x232   : > { %1514 = vmatpush.msrb.mxu2 %v1464_v18  ;;  %v1598_v18 = vld [vmem:[#allocation6 + $0x360] sm:$0xff]  ;;  %p2163_p7 = por %p2162_p4, %p2161_p3 }
 0x233   : > { %1559 = vmatpush.msrb.mxu1 %v1529_v3  ;;  %1583 = vmatpush.msrb.mxu0 %v1541_v21  ;;  %v1751_v21 = vld [vmem:[#allocation6 + $0x540] sm:$0xff] }
 0x234   : > { %p2164_p8 = pnand %p2163_p7, %p2159_p2 }
 0x235   : > { %1560 = vmatpush.msrb.mxu1 %v1528_v7  ;;  %1584 = vmatpush.msrb.mxu0 %v1540_v24  ;;  %v1600_v7 = vld [vmem:[#allocation6 + $0x370] sm:$0xff]  ;;  %v1672_v24 = vld [vmem:[#allocation6 + $0x448] sm:$0xff] }
 0x237   : > { %1561 = vmatpush.msrb.mxu1 %v1527_v9  ;;  %1585 = vmatpush.msrb.mxu0 %v1539_v26 }
 0x239   : > { %1562 = vmatpush.msrb.mxu1 %v1526_v10  ;;  %1586 = vmatpush.msrb.mxu0 %v1538_v29  ;;  %v1675_v10 = vld [vmem:[#allocation6 + $0x460] sm:$0xff]  ;;  %v1596_v29 = vld [vmem:[#allocation6 + $0x350] sm:$0xff] }
 0x23b   : > { %1563 = vmatpush.msrb.mxu1 %v1525_v15  ;;  %1587 = vmatpush.msrb.mxu0 %v1537_v39  ;;  %v1683_v15 = vld [vmem:[#allocation6 + $0x4a0] sm:$0xff] }
 0x23c   : > { %v1671_v39 = vld [vmem:[#allocation6 + $0x440] sm:$0xff] }
 0x23d   : > { %1564 = vmatpush.msrb.mxu1 %v1524_v19  ;;  %v1673_v19 = vld [vmem:[#allocation6 + $0x450] sm:$0xff] }
 0x23f   : > { %1565 = vmatpush.msrb.mxu1 %v1523_v22  ;;  %v1597_v22 = vld [vmem:[#allocation6 + $0x358] sm:$0xff] }
 0x241   : > { %1566 = vmatpush.msrb.mxu1 %v1522_v25  ;;  %v1681_v25 = vld [vmem:[#allocation6 + $0x490] sm:$0xff] }
 0x243   : > { %1567 = vmatpush.msrb.mxu1 %v1521_v28  ;;  %v1750_v28 = vld [vmem:[#allocation6 + $0x538] sm:$0xff] }
 0x281   : > { %v1285_v30 = vpop.permute.xlu2 %1284 }
 0x282   : > { %v2576_v12 = vmax.f32 %v2564_v23, %v1285_v30 }
 0x284   : > { %v1402_v32 = vrot.slane %v2576_v12, 2  ;;  %1991 = vmatmul.msk.f32.vlgmr.msra.gmra.mxu3 %vm1328_vm9, %v2576_v12  ;;  %v1475_v37 = vrot.slane %v2576_v12, 4  ;;  %v1548_v3 = vrot.slane %v2576_v12, 6  ;;  %v1749_v12 = vld [vmem:[#allocation6 + $0x530] sm:$0xff] }
 0x285   : > { %1649 = vmatpush.msra.mxu3 %v1619_v31  ;;  %v1595_v31 = vld [vmem:[#allocation6 + $0x348] sm:$0xff] }
 0x286   : > { %1992 = vmatmul.msk.f32.vlgmr.msra.gmra.mxu2 %vm1328_vm9, %v1402_v32 }
 0x287   : > { %1623 = vmatpush.msra.mxu2 %v1609_v33  ;;  %1650 = vmatpush.msra.mxu3 %v1618_v34  ;;  %v1670_v33 = vld [vmem:[#allocation6 + $0x438] sm:$0xff]  ;;  %v1748_v34 = vld [vmem:[#allocation6 + $0x528] sm:$0xff] }
 0x289   : > { %1624 = vmatpush.msra.mxu2 %v1608_v35  ;;  %1651 = vmatpush.msra.mxu3 %v1617_v36  ;;  %v1283_v23 = vpop.permute.xlu2 %1282  ;;  %v1594_v35 = vld [vmem:[#allocation6 + $0x340] sm:$0xff]  ;;  %v1669_v36 = vld [vmem:[#allocation6 + $0x430] sm:$0xff] }
 0x28a   : > { %v1291_v42 = vsel %vm1290_vm10, %v1283_v23, %v1285_v30  ;;  %v1764_v23 = vld [vmem:[#allocation6 + $0x5a8] sm:$0xff] }
 0x28b   : > { %v1297_v46 = vmax.f32 %v2571_v43, %v1291_v42  ;;  %1625 = vmatpush.msra.mxu2 %v1607_v38  ;;  %1652 = vmatpush.msra.mxu3 %v1616_v40  ;;  %v1613_v43 = vld [vmem:[#allocation6 + $0x3d8] sm:$0xff]  ;;  %v1747_v40 = vld [vmem:[#allocation6 + $0x520] sm:$0xff]  ;;  %v1668_v42 = vld [vmem:[#allocation6 + $0x428] sm:$0xff] }
 0x28d   : > { %1626 = vmatpush.msra.mxu2 %v1606_v44  ;;  %1653 = vmatpush.msra.mxu3 %v1615_v45  ;;  %v1401_v48 = vrot.slane %v1297_v46, 2  ;;  %v1474_v49 = vrot.slane %v1297_v46, 4  ;;  %v1547_v61 = vrot.slane %v1297_v46, 6  ;;  %v1746_v44 = vld [vmem:[#allocation6 + $0x518] sm:$0xff]  ;;  %v1763_v45 = vld [vmem:[#allocation6 + $0x5a0] sm:$0xff] }
 0x28e   : > { %1348 = vmatmul.f32.vlgmr.msra.gmra.mxu1 %v1297_v46  ;;  %1993 = vmatmul.msk.f32.vlgmr.msrb.gmra.mxu2 %vm1328_vm9, %v1475_v37  ;;  %v1667_v46 = vld [vmem:[#allocation6 + $0x420] sm:$0xff]  ;;  %v1745_v37 = vld [vmem:[#allocation6 + $0x510] sm:$0xff] }
 0x28f   : > { %1723 = vmatpush.msra.mxu1 %v1690_v27  ;;  %1627 = vmatpush.msra.mxu2 %v1605_v41  ;;  %v1762_v27 = vld [vmem:[#allocation6 + $0x598] sm:$0xff] }
 0x290   : > { %1654 = vmatpush.msra.mxu3 %v1614_v47  ;;  %1422 = vmatmul.f32.vlgmr.msra.gmra.mxu0 %v1401_v48  ;;  %v1666_v41 = vld [vmem:[#allocation6 + $0x418] sm:$0xff]  ;;  %v1761_v47 = vld [vmem:[#allocation6 + $0x590] sm:$0xff] }
 0x291   : > { %1495 = vmatmul.f32.vlgmr.msrb.gmra.mxu3 %v1474_v49  ;;  %1697 = vmatpush.msra.mxu0 %v1680_v50  ;;  %v1665_v48 = vld [vmem:[#allocation6 + $0x410] sm:$0xff]  ;;  %v1743_v49 = vld [vmem:[#allocation6 + $0x500] sm:$0xff]  ;;  %v1760_v50 = vld [vmem:[#allocation6 + $0x588] sm:$0xff] }
 0x292   : > { %1724 = vmatpush.msra.mxu1 %v1689_v51  ;;  %1628 = vmatpush.msra.mxu2 %v1604_v52  ;;  %v1742_v52 = vld [vmem:[#allocation6 + $0x4f8] sm:$0xff] }
 0x293   : > { %1655 = vmatpush.msra.mxu3 %v1613_v43  ;;  %1698 = vmatpush.msra.mxu0 %v1679_v53  ;;  %v1759_v43 = vld [vmem:[#allocation6 + $0x580] sm:$0xff]  ;;  %v1741_v53 = vld [vmem:[#allocation6 + $0x4f0] sm:$0xff] }
 0x294   : > { %1725 = vmatpush.msra.mxu1 %v1688_v54  ;;  %1629 = vmatpush.msra.mxu2 %v1603_v55  ;;  %v1758_v54 = vld [vmem:[#allocation6 + $0x578] sm:$0xff]  ;;  %v1740_v55 = vld [vmem:[#allocation6 + $0x4e8] sm:$0xff] }
 0x295   : > { %1656 = vmatpush.msra.mxu3 %v1612_v56  ;;  %1699 = vmatpush.msra.mxu0 %v1678_v57  ;;  %v1757_v56 = vld [vmem:[#allocation6 + $0x570] sm:$0xff]  ;;  %v1739_v57 = vld [vmem:[#allocation6 + $0x4e0] sm:$0xff] }
 0x296   : > { %1726 = vmatpush.msra.mxu1 %v1687_v58  ;;  %1630 = vmatpush.msra.mxu2 %v1602_v59  ;;  %v1756_v58 = vld [vmem:[#allocation6 + $0x568] sm:$0xff] }
 0x297   : > { %1657 = vmatpush.msra.mxu3 %v1611_v60  ;;  %1568 = vmatmul.f32.vlgmr.msrb.gmra.mxu1 %v1547_v61  ;;  %v1287_v26 = vpop.permute.xlu0 %1286  ;;  %v1755_v60 = vld [vmem:[#allocation6 + $0x560] sm:$0xff] }
 0x298   : > { %1700 = vmatpush.msra.mxu0 %v1677_v62  ;;  %1727 = vmatpush.msra.mxu1 %v1686_v63  ;;  %v1289_v6 = vpop.permute.xlu1 %1288 }
 0x299   : > { %1631 = vmatpush.msra.mxu2 %v1601_v0  ;;  %1658 = vmatpush.msra.mxu3 %v1610_v1  ;;  %v2589_v9 = vmax.f32 %v2559_v20, %v1289_v6  ;;  %v1682_v20 = vld [vmem:[#allocation6 + $0x498] sm:$0xff]  ;;  %v1292_v32 = vsel %vm1290_vm10, %v1287_v26, %v1289_v6 }
 0x29a   : > { %1994 = vmatmul.msk.f32.vlgmr.msrb.gmra.mxu0 %vm1328_vm9, %v1548_v3  ;;  %1728 = vmatpush.msra.mxu1 %v1685_v2  ;;  %v1299_v38 = vmax.f32 %v2557_v17, %v1292_v32  ;;  %v1744_v17 = vld [vmem:[#allocation6 + $0x508] sm:$0xff]  ;;  %v1301_v3 = vld [vmem:[%s2643_s6] sm:$0x1] }
 0x29b   : > { %1701 = vmatpush.msra.mxu0 %v1676_v4  ;;  %1770 = vmatpush.msrb.mxu3 %v1754_v5  ;;  %v1693_v30 = vrot.slane %v2589_v9, 2  ;;  %v1766_v61 = vrot.slane %v2589_v9, 4 }
 0x29c   : > { %1632 = vmatpush.msra.mxu2 %v1600_v7  ;;  %1729 = vmatpush.msra.mxu1 %v1684_v8  ;;  %v1692_v51 = vrot.slane %v1299_v38, 2  ;;  %v1765_v59 = vrot.slane %v1299_v38, 4 }
 0x29d   : > { %1702 = vmatpush.msra.mxu0 %v1675_v10  ;;  %1771 = vmatpush.msrb.mxu3 %v1753_v11 }
 0x29e   : > { %1633 = vmatpush.msra.mxu2 %v1599_v13  ;;  %1995 = vmatmul.msk.f32.vlgmr.msra.gmra.mxu3 %vm1328_vm9, %v2589_v9 }
 0x29f   : > { %1703 = vmatpush.msra.mxu0 %v1674_v14  ;;  %1730 = vmatpush.msra.mxu1 %v1683_v15 }
 0x2a0   : > { %1772 = vmatpush.msrb.mxu3 %v1752_v16  ;;  %1634 = vmatpush.msra.mxu2 %v1598_v18 }
 0x2a1   : > { %1704 = vmatpush.msra.mxu0 %v1673_v19  ;;  %1731 = vmatpush.msra.mxu1 %v1682_v20 }
 0x2a2   : > { %1773 = vmatpush.msrb.mxu3 %v1751_v21  ;;  %1635 = vmatpush.msra.mxu2 %v1597_v22 }
 0x2a3   : > { %1705 = vmatpush.msra.mxu0 %v1672_v24  ;;  %1732 = vmatpush.msra.mxu1 %v1681_v25 }
 0x2a4   : > { %1774 = vmatpush.msrb.mxu3 %v1750_v28  ;;  %1636 = vmatpush.msra.mxu2 %v1596_v29 }
 0x2a5   : > { %1996 = vmatmul.msk.f32.vlgmr.msra.gmra.mxu1 %vm1328_vm9, %v1693_v30  ;;  %1706 = vmatpush.msra.mxu0 %v1671_v39 }
 0x2a6   : > { %1775 = vmatpush.msrb.mxu3 %v1749_v12  ;;  %1637 = vmatpush.msra.mxu2 %v1595_v31 }
 0x2a7   : > { %1707 = vmatpush.msra.mxu0 %v1670_v33 }
 0x2a8   : > { %1776 = vmatpush.msrb.mxu3 %v1748_v34  ;;  %1638 = vmatpush.msra.mxu2 %v1594_v35 }
 0x2a9   : > { %1639 = vmatmul.f32.vlgmr.msra.gmra.mxu2 %v1299_v38  ;;  %1708 = vmatpush.msra.mxu0 %v1669_v36 }
 0x2aa   : > { %1777 = vmatpush.msrb.mxu3 %v1747_v40  ;;  %1796 = vmatpush.msrb.mxu2 %v1764_v23 }
 0x2ab   : > { %1709 = vmatpush.msra.mxu0 %v1668_v42 }
 0x2ac   : > { %1778 = vmatpush.msrb.mxu3 %v1746_v44  ;;  %1797 = vmatpush.msrb.mxu2 %v1763_v45 }
 0x2ad   : > { %1710 = vmatpush.msra.mxu0 %v1667_v46 }
 0x2ae   : > { %1779 = vmatpush.msrb.mxu3 %v1745_v37  ;;  %1798 = vmatpush.msrb.mxu2 %v1762_v27 }
 0x2af   : > { %1711 = vmatpush.msra.mxu0 %v1666_v41 }
 0x2b0   : > { %1780 = vmatpush.msrb.mxu3 %v1744_v17  ;;  %1799 = vmatpush.msrb.mxu2 %v1761_v47 }
 0x2b1   : > { %1712 = vmatpush.msra.mxu0 %v1665_v48 }
 0x2b2   : > { %1781 = vmatpush.msrb.mxu3 %v1743_v49  ;;  %1800 = vmatpush.msrb.mxu2 %v1760_v50 }
 0x2b3   : > { %1713 = vmatmul.f32.vlgmr.msra.gmra.mxu0 %v1692_v51 }
 0x2b4   : > { %1782 = vmatpush.msrb.mxu3 %v1742_v52  ;;  %1801 = vmatpush.msrb.mxu2 %v1759_v43 }
 0x2b6   : > { %1783 = vmatpush.msrb.mxu3 %v1741_v53  ;;  %1802 = vmatpush.msrb.mxu2 %v1758_v54 }
 0x2b8   : > { %1784 = vmatpush.msrb.mxu3 %v1740_v55  ;;  %1803 = vmatpush.msrb.mxu2 %v1757_v56 }
 0x2ba   : > { %1785 = vmatpush.msrb.mxu3 %v1739_v57  ;;  %1804 = vmatpush.msrb.mxu2 %v1756_v58 }
 0x2bb   : > { %1786 = vmatmul.f32.vlgmr.msrb.gmra.mxu3 %v1765_v59 }
 0x2bc   : > { %1805 = vmatpush.msrb.mxu2 %v1755_v60 }
 0x2bd   : > { %1997 = vmatmul.msk.f32.vlgmr.msrb.gmra.mxu2 %vm1328_vm9, %v1766_v61 }
 0x307   : > { %v1369_v63 = vpop.f32.mrf.mxu3 }
 0x309   : > { %v1443_v62 = vpop.f32.mrf.mxu2 }
 0x30b   : > { %v1349_v1 = vpop.f32.mrf.mxu1 }
 0x30c   : > { %v1370_v2 = vadd.f32 %v1369_v63, %v1349_v1 }
 0x30d   : > { %v1423_v0 = vpop.f32.mrf.mxu0 }
 0x30e   : > { %v1372_v6 = vadd.f32 %v1370_v2, %v1301_v3  ;;  %v1444_v7 = vadd.f32 %v1443_v62, %v1423_v0 }
 0x310   : > { %v1446_v11 = vadd.f32 %v1444_v7, %v1372_v6 }
 0x311   : > { %v1516_v4 = vpop.f32.mrf.mxu2 }
 0x314   : > { %v1496_v5 = vpop.f32.mrf.mxu3  ;;  %v1569_v9 = vpop.f32.mrf.mxu1 }
 0x315   : > { %v1517_v10 = vadd.f32 %v1516_v4, %v1496_v5 }
 0x317   : > { %v1589_v8 = vpop.f32.mrf.mxu0  ;;  %v1519_v14 = vadd.f32 %v1517_v10, %v1446_v11 }
 0x318   : > { %v1590_v15 = vadd.f32 %v1589_v8, %v1569_v9 }
 0x31a   : > { %v1592_v20 = vadd.f32 %v1590_v15, %v1519_v14 }
 0x321   : > { %v1660_v16 = vpop.f32.mrf.mxu3 }
 0x322   : > { %v1734_v21 = vpop.f32.mrf.mxu1 }
 0x32c   : > { %v1640_v13 = vpop.f32.mrf.mxu2 }
 0x32d   : > { %v1661_v18 = vadd.f32 %v1660_v16, %v1640_v13 }
 0x32f   : > { %v1663_v22 = vadd.f32 %v1661_v18, %v1592_v20 }
 0x330   : > { %v1714_v19 = vpop.f32.mrf.mxu0 }
 0x331   : > { %v1735_v24 = vadd.f32 %v1734_v21, %v1714_v19 }
 0x333   : > { %v1737_v28 = vadd.f32 %v1735_v24, %v1663_v22 }
 0x33e   : > { %v1787_v25 = vpop.f32.mrf.mxu3 }
 0x340   : > { %v1807_v26 = vpop.f32.mrf.mxu2 }
 0x341   : > { %v1808_v29 = vadd.f32 %v1807_v26, %v1787_v25 }
 0x343   : > { %v1810_v39 = vadd.f32 %v1808_v29, %v1737_v28 }
 0x345   : > { %v1812_v30 = vsel %vm1811_vm11, %v1810_v39, -inf }
 0x346   : > { %1813 = vmax.xlane.f32.xlu2 %v1812_v30 }
 0x3b9   : > { %v1814_v12 = vpop.xlane.xlu2 %1813 }
 0x3ba   : > { %v1815_v31 = vsub.f32 %v1810_v39, %v1814_v12 }
 0x3bc   : > { %v1816_v32 = vmul.f32 1.442695, %v1815_v31 }
 0x3be   : > { %2076 = vpow2.f32 %v1816_v32 }
 0x3c4   : > { %v2077_v33 = vpop.eup %2076 }
 0x3c5   : > { %v1818_v34 = vsel %vm1811_vm11, %v2077_v33, 0.0 }
 0x3c6   : > { %1819 = vadd.xlane.f32.xlu0 %v1818_v34 }
 0x439   : > { %v1820_v35 = vpop.xlane.xlu0 %1819 }
 0x43a   : > { %2078 = vlog2.f32 %v1820_v35 }
 0x440   : > { %v2079_v36 = vpop.eup %2078 }
 0x441   : > { %v1822_v38 = vmul.f32 0.6931472, %v2079_v36 }
 0x443   : > { %v1823_v40 = vsub.f32 %v1815_v31, %v1822_v38 }
 0x445   : > { %1824 = vst.msk [vmem:[%s304_s8] sm:$0x1] %vm1811_vm11, %v1823_v40 }
 0x446   : > { %2167 = shalt.err (!%p2164_p8)
}
 0x447   : > { %2017 = dma.vmem_to_hbm [thread:$0]  (%p2299_p5), %s1837_s9, 16, %s1839_s14, %s1826_s15  }
 0x448 PF: > { %p2034_p9 = scmp.ge.s32.totalorder %s2210_s27, 2  ;;  %s1850_s20 = sand.u32 1, %s2198_s24  }
 0x449   : > { %s1851_s21 = scalar_lea.sflag [#allocation5], %s1850_s20 }
 0x44a   : > { %p2027_p10 = pnand %p2034_p9, %p2303_p6 }
 0x44c   : > { %p2028_p11 = pneg %p2027_p10 }
 0x44e   : > { %2193 = dma.done.wait (%p2028_p11), %s1851_s21, 16  }
 0x44f   : > { %2195 = vsyncadd (%p2028_p11), %s1851_s21, 4294967280  ;;  %p19_p12 = scmp.ge.s32.totalorder %s2286_s30, 4   ;;  %s2648_s24 = smov %s2202_s25 }
 0x450   : > { %s2649_s25 = smov %s2206_s26  ;;  %s2650_s26 = smov %s2297_s10 }
 0x451   : > { %s2651_s27 = smov %s2286_s30  ;;  %21 = sbr.rel (!%p19_p12) target bundleno = 5 (0x5), region = 104 }
 0x456   :  { %1856 = vsyncpa [#allocation4], 1 }
 0x457   :  { %1858 = vsyncpa [#allocation4 + $0x1], 1 }
 0x458   :  { %1859 = vsyncpa [#allocation7], 1 }
 0x459   :  { %1860 = vsyncpa [#allocation5], 1 }
 0x45a   :  { %1862 = vsyncpa [#allocation5 + $0x1], 1 }

</bundles_post_ra>
